<compile_context>
chip_gen: v5e
topology: v5e:2x2
jax: 0.10.0
libtpu: 0.0.40
codegen_flags: <defaults>
</compile_context>

<pallas_src>
import functools

import jax
import jax.numpy as jnp
from jax import lax
from jax.experimental import pallas as pl
from jax.experimental.pallas import tpu as pltpu


def _round_up(x, m):
    return ((x + m - 1) // m) * m


# ---------------------------------------------------------------------------
# Fused backbone + head kernel
# ---------------------------------------------------------------------------
def _nima_fused_kernel(x_ref, ws_ref, bs_ref, wp_ref, bp_ref, wh_ref, bh_ref,
                       o_ref, acc_ref, *, p_total, tp):
    """Grid = (batch, pixel_tiles).

    x_ref  : (1, tp, Kp)     im2col patches for one pixel tile of one image
    ws/bs  : (Kp, Cmid) / (1, Cmid)      stem conv weights (f32)
    wp/bp  : (Cmid, Cfeat) bf16 / (1, Cfeat)   1x1 conv to 1280
    wh/bh  : (Cfeat, 10) / (1, 10)       head linear
    o_ref  : (1, 1, 10)      softmax output for this image
    acc_ref: (1, Cfeat) f32  running global-average-pool sum (VMEM scratch)
    """
    pj = pl.program_id(1)

    @pl.when(pj == 0)
    def _init():
        acc_ref[...] = jnp.zeros_like(acc_ref)

    x = x_ref[0]                                             # (tp, Kp)

    # stem: 3x3/s2 conv (as im2col matmul) + ReLU6
    h = jnp.dot(x, ws_ref[...], preferred_element_type=jnp.float32)
    h = jnp.clip(h + bs_ref[...], 0.0, 6.0)                  # (tp, Cmid)

    # 1x1 conv to Cfeat + ReLU6 (bf16 MXU inputs, f32 accumulation)
    y = jnp.dot(h.astype(wp_ref.dtype), wp_ref[...],
                preferred_element_type=jnp.float32)
    y = jnp.clip(y + bp_ref[...], 0.0, 6.0)                  # (tp, Cfeat)

    # mask padded pixel rows so they do not contribute to the global pool
    rows = pj * tp + lax.broadcasted_iota(jnp.int32, (tp, 1), 0)
    y = jnp.where(rows < p_total, y, 0.0)

    acc_ref[...] += jnp.sum(y, axis=0, keepdims=True)        # (1, Cfeat)

    @pl.when(pj == pl.num_programs(1) - 1)
    def _finalize():
        pooled = acc_ref[...] * (1.0 / p_total)              # global avg pool
        z = jnp.maximum(pooled, 0.0)                         # ReLU (Dropout = id, eval)
        logits = jnp.dot(z, wh_ref[...], preferred_element_type=jnp.float32)
        logits = logits + bh_ref[...]                        # (1, 10)
        m = jnp.max(logits, axis=1, keepdims=True)
        e = jnp.exp(logits - m)
        probs = e * pl.reciprocal(jnp.sum(e, axis=1, keepdims=True),
                                  approx=False)
        o_ref[...] = probs[None]                             # (1, 1, 10)


# ---------------------------------------------------------------------------
# NIMA forward
# ---------------------------------------------------------------------------
@jax.jit
def nima_forward(x_nchw, params):
    """x_nchw: (N, 3, H, W) float32 -> (N, 10) softmax distribution."""
    n = x_nchw.shape[0]

    # --- im2col glue for the stem conv (3x3, stride 2, pad 1) ---
    patches = lax.conv_general_dilated_patches(
        x_nchw, filter_shape=(3, 3), window_strides=(2, 2),
        padding=((1, 1), (1, 1)))                    # (N, C*9, H/2, W/2)
    _, k, hp, wp = patches.shape
    p = hp * wp
    patches = patches.transpose(0, 2, 3, 1).reshape(n, p, k)

    cmid = params["w_stem"].shape[1]
    cfeat = params["w_pw"].shape[1]
    nclass = params["w_head"].shape[1]

    # pad contraction dim to a multiple of 8 and pixel dim to the tile size
    kp = _round_up(k, 8)
    tp = min(512, _round_up(p, 8))
    p_pad = _round_up(p, tp)
    patches = jnp.pad(patches, ((0, 0), (0, p_pad - p), (0, kp - k)))
    w_stem = jnp.pad(params["w_stem"], ((0, kp - k), (0, 0)))

    b_stem = params["b_stem"].reshape(1, cmid)
    w_pw = params["w_pw"].astype(jnp.bfloat16)       # bf16 MXU operand
    b_pw = params["b_pw"].reshape(1, cfeat)
    w_head = params["w_head"]
    b_head = params["b_head"].reshape(1, nclass)

    kernel = functools.partial(_nima_fused_kernel, p_total=p, tp=tp)

    out = pl.pallas_call(
        kernel,
        out_shape=jax.ShapeDtypeStruct((n, 1, nclass), jnp.float32),
        grid_spec=pltpu.PrefetchScalarGridSpec(
            num_scalar_prefetch=0,
            grid=(n, p_pad // tp),
            in_specs=[
                pl.BlockSpec((1, tp, kp), lambda b, j: (b, j, 0)),
                pl.BlockSpec((kp, cmid), lambda b, j: (0, 0)),
                pl.BlockSpec((1, cmid), lambda b, j: (0, 0)),
                pl.BlockSpec((cmid, cfeat), lambda b, j: (0, 0)),
                pl.BlockSpec((1, cfeat), lambda b, j: (0, 0)),
                pl.BlockSpec((cfeat, nclass), lambda b, j: (0, 0)),
                pl.BlockSpec((1, nclass), lambda b, j: (0, 0)),
            ],
            out_specs=pl.BlockSpec((1, 1, nclass), lambda b, j: (b, 0, 0)),
            scratch_shapes=[pltpu.VMEM((1, cfeat), jnp.float32)],
        ),
        compiler_params=pltpu.CompilerParams(
            dimension_semantics=("parallel", "arbitrary")),
    )(patches, w_stem, b_stem, w_pw, b_pw, w_head, b_head)

    return out.reshape(n, nclass)


def nima_reference(x_nchw, params):
    """Pure-JAX reference of the same stand-in network (f32 end to end)."""
    n = x_nchw.shape[0]
    patches = lax.conv_general_dilated_patches(
        x_nchw, (3, 3), (2, 2), ((1, 1), (1, 1)))
    _, k, hp, wp = patches.shape
    patches = patches.transpose(0, 2, 3, 1).reshape(n, hp * wp, k)
    h = jnp.clip(patches @ params["w_stem"] + params["b_stem"], 0.0, 6.0)
    y = jnp.clip(h @ params["w_pw"] + params["b_pw"], 0.0, 6.0)
    pooled = jnp.mean(y, axis=1)
    z = jnp.maximum(pooled, 0.0)
    logits = z @ params["w_head"] + params["b_head"]
    return jax.nn.softmax(logits, axis=-1)


def init_params(key, cin=3, cmid=32, cfeat=1280, nclass=10):
    k1, k2, k3, k4, k5, k6 = jax.random.split(key, 6)
    return {
        "w_stem": 0.1 * jax.random.normal(k1, (cin * 9, cmid), jnp.float32),
        "b_stem": 0.05 * jax.random.normal(k2, (cmid,), jnp.float32),
        "w_pw": 0.05 * jax.random.normal(k3, (cmid, cfeat), jnp.float32),
        "b_pw": 0.05 * jax.random.normal(k4, (cfeat,), jnp.float32),
        "w_head": 0.05 * jax.random.normal(k5, (cfeat, nclass), jnp.float32),
        "b_head": 0.05 * jax.random.normal(k6, (nclass,), jnp.float32),
    }


if __name__ == "__main__":
    key = jax.random.PRNGKey(0)
    kx, kp = jax.random.split(key)

    # small deterministic input, PyTorch NCHW layout: (batch=2, C=3, 16, 16)
    x = jax.random.normal(kx, (2, 3, 16, 16), jnp.float32)
    params = init_params(kp)

    out = nima_forward(x, params)
    out = jax.block_until_ready(out)

    assert out.shape == (2, 10)
    assert bool(jnp.all(jnp.isfinite(out)))
    # softmax rows sum to 1
    assert bool(jnp.allclose(jnp.sum(out, axis=1), 1.0, atol=1e-5))
    # matches pure-JAX reference (bf16 matmul operands -> loose tolerance)
    ref = nima_reference(x, params)
    assert bool(jnp.allclose(out, ref, atol=2e-2)), (out, ref)

    print("KERNEL_OK")
</pallas_src>

<mosaic_0001>
module attributes {stable_mosaic.version = 11 : i64} {
  func.func @_nima_fused_kernel(%arg0: i32, %arg1: i32, %arg2: memref<1x64x32xf32, #tpu.memory_space<vmem>>, %arg3: memref<32x32xf32, #tpu.memory_space<vmem>>, %arg4: memref<1x32xf32, #tpu.memory_space<vmem>>, %arg5: memref<32x1280xbf16, #tpu.memory_space<vmem>>, %arg6: memref<1x1280xf32, #tpu.memory_space<vmem>>, %arg7: memref<1280x10xf32, #tpu.memory_space<vmem>>, %arg8: memref<1x10xf32, #tpu.memory_space<vmem>>, %arg9: memref<1x1x10xf32, #tpu.memory_space<vmem>>, %arg10: memref<1x1280xf32, #tpu.memory_space<vmem>>) attributes {dimension_semantics = [#tpu.dimension_semantics<parallel>, #tpu.dimension_semantics<arbitrary>], iteration_bounds = array<i64: 2, 1>, scalar_prefetch = 0 : i64, scratch_operands = 1 : i64, tpu.core_type = #tpu.core_type<tc>, window_params = [{transform_indices = @transform_0, window_bounds = array<i64: 1, 64, 32>}, {pipeline_mode = #tpu.pipeline_mode<synchronous>, transform_indices = @transform_1, window_bounds = array<i64: 32, 32>}, {pipeline_mode = #tpu.pipeline_mode<synchronous>, transform_indices = @transform_2, window_bounds = array<i64: 1, 32>}, {pipeline_mode = #tpu.pipeline_mode<synchronous>, transform_indices = @transform_3, window_bounds = array<i64: 32, 1280>}, {pipeline_mode = #tpu.pipeline_mode<synchronous>, transform_indices = @transform_4, window_bounds = array<i64: 1, 1280>}, {pipeline_mode = #tpu.pipeline_mode<synchronous>, transform_indices = @transform_5, window_bounds = array<i64: 1280, 10>}, {pipeline_mode = #tpu.pipeline_mode<synchronous>, transform_indices = @transform_6, window_bounds = array<i64: 1, 10>}, {transform_indices = @transform_7, window_bounds = array<i64: 1, 1, 10>}]} {
    %c0_i32 = arith.constant 0 : i32
    %0 = arith.cmpi eq, %arg1, %c0_i32 : i32
    %1 = arith.extui %0 : i1 to i32
    %c0_i32_0 = arith.constant 0 : i32
    %2 = arith.cmpi ne, %1, %c0_i32_0 : i32
    scf.if %2 {
      %cst_25 = arith.constant 0.000000e+00 : f32
      %42 = vector.broadcast %cst_25 : f32 to vector<1x1280xf32>
      %c0_26 = arith.constant 0 : index
      %c0_27 = arith.constant 0 : index
      %43 = vector.load %arg10[%c0_26, %c0_27] : memref<1x1280xf32, #tpu.memory_space<vmem>>, vector<1x1280xf32>
      tpu.vector_store %arg10[%c0_26, %c0_27], %42 {strides = array<i32>} : memref<1x1280xf32, #tpu.memory_space<vmem>>, vector<1x1280xf32>,
    } else {
    }
    %c0 = arith.constant 0 : index
    %c0_1 = arith.constant 0 : index
    %c0_2 = arith.constant 0 : index
    %3 = vector.load %arg2[%c0, %c0_1, %c0_2] : memref<1x64x32xf32, #tpu.memory_space<vmem>>, vector<1x64x32xf32>
    %4 = vector.shape_cast %3 : vector<1x64x32xf32> to vector<64x32xf32>
    %c0_3 = arith.constant 0 : index
    %c0_4 = arith.constant 0 : index
    %5 = vector.load %arg3[%c0_3, %c0_4] : memref<32x32xf32, #tpu.memory_space<vmem>>, vector<32x32xf32>
    %cst = arith.constant dense<0.000000e+00> : vector<64x32xf32>
    %6 = tpu.matmul %4, %5, %cst {dimension_numbers = #tpu.dot_dimension_numbers<[1], [0], [0], [1], [0, 0, 1, 1], [], []>} : vector<64x32xf32>, vector<32x32xf32>, vector<64x32xf32> -> vector<64x32xf32>
    %c0_5 = arith.constant 0 : index
    %c0_6 = arith.constant 0 : index
    %7 = vector.load %arg4[%c0_5, %c0_6] : memref<1x32xf32, #tpu.memory_space<vmem>>, vector<1x32xf32>
    %8 = vector.broadcast %7 : vector<1x32xf32> to vector<64x32xf32>
    %9 = arith.addf %6, %8 : vector<64x32xf32>
    %cst_7 = arith.constant 0.000000e+00 : f32
    %cst_8 = arith.constant 6.000000e+00 : f32
    %10 = vector.broadcast %cst_7 : f32 to vector<64x32xf32>
    %11 = arith.maximumf %10, %9 : vector<64x32xf32>
    %12 = vector.broadcast %cst_8 : f32 to vector<64x32xf32>
    %13 = arith.minimumf %12, %11 : vector<64x32xf32>
    %14 = arith.truncf %13 : vector<64x32xf32> to vector<64x32xbf16>
    %c0_9 = arith.constant 0 : index
    %c0_10 = arith.constant 0 : index
    %15 = vector.load %arg5[%c0_9, %c0_10] : memref<32x1280xbf16, #tpu.memory_space<vmem>>, vector<32x1280xbf16>
    %cst_11 = arith.constant dense<0.000000e+00> : vector<64x1280xf32>
    %16 = tpu.matmul %14, %15, %cst_11 {dimension_numbers = #tpu.dot_dimension_numbers<[1], [0], [0], [1], [0, 0, 1, 1], [], []>} : vector<64x32xbf16>, vector<32x1280xbf16>, vector<64x1280xf32> -> vector<64x1280xf32>
    %c0_12 = arith.constant 0 : index
    %c0_13 = arith.constant 0 : index
    %17 = vector.load %arg6[%c0_12, %c0_13] : memref<1x1280xf32, #tpu.memory_space<vmem>>, vector<1x1280xf32>
    %18 = vector.broadcast %17 : vector<1x1280xf32> to vector<64x1280xf32>
    %19 = arith.addf %16, %18 : vector<64x1280xf32>
    %cst_14 = arith.constant 0.000000e+00 : f32
    %cst_15 = arith.constant 6.000000e+00 : f32
    %20 = vector.broadcast %cst_14 : f32 to vector<64x1280xf32>
    %21 = arith.maximumf %20, %19 : vector<64x1280xf32>
    %22 = vector.broadcast %cst_15 : f32 to vector<64x1280xf32>
    %23 = arith.minimumf %22, %21 : vector<64x1280xf32>
    %c64_i32 = arith.constant 64 : i32
    %24 = arith.muli %arg1, %c64_i32 : i32
    %25 = tpu.iota {dimensions = array<i32: 0>} : vector<64x1xi32>
    %26 = vector.broadcast %24 : i32 to vector<64x1xi32>
    %27 = arith.addi %26, %25 : vector<64x1xi32>
    %c64_i32_16 = arith.constant 64 : i32
    %28 = vector.broadcast %c64_i32_16 : i32 to vector<64x1xi32>
    %29 = arith.cmpi slt, %27, %28 : vector<64x1xi32>
    %cst_17 = arith.constant 0.000000e+00 : f32
    %30 = vector.shape_cast %29 : vector<64x1xi1> to vector<64x1xi1>
    %31 = vector.broadcast %30 : vector<64x1xi1> to vector<64x1280xi1>
    %32 = vector.broadcast %cst_17 : f32 to vector<64x1280xf32>
    %33 = arith.select %31, %23, %32 : vector<64x1280xi1>, vector<64x1280xf32>
    %c0_18 = arith.constant 0 : index
    %c0_19 = arith.constant 0 : index
    %34 = vector.load %arg10[%c0_18, %c0_19] : memref<1x1280xf32, #tpu.memory_space<vmem>>, vector<1x1280xf32>
    %cst_20 = arith.constant dense<0.000000e+00> : vector<1280xf32>
    %35 = vector.multi_reduction <add>, %33, %cst_20 [0] : vector<64x1280xf32> to vector<1280xf32>
    %36 = vector.shape_cast %35 : vector<1280xf32> to vector<1x1280xf32>
    %37 = arith.addf %34, %36 : vector<1x1280xf32>
    %c0_21 = arith.constant 0 : index
    %c0_22 = arith.constant 0 : index
    %38 = vector.load %arg10[%c0_21, %c0_22] : memref<1x1280xf32, #tpu.memory_space<vmem>>, vector<1x1280xf32>
    tpu.vector_store %arg10[%c0_21, %c0_22], %37 {strides = array<i32>} : memref<1x1280xf32, #tpu.memory_space<vmem>>, vector<1x1280xf32>,
    %c0_i32_23 = arith.constant 0 : i32
    %39 = arith.cmpi eq, %arg1, %c0_i32_23 : i32
    %40 = arith.extui %39 : i1 to i32
    %c0_i32_24 = arith.constant 0 : i32
    %41 = arith.cmpi ne, %40, %c0_i32_24 : i32
    scf.if %41 {
      %c0_25 = arith.constant 0 : index
      %c0_26 = arith.constant 0 : index
      %42 = vector.load %arg10[%c0_25, %c0_26] : memref<1x1280xf32, #tpu.memory_space<vmem>>, vector<1x1280xf32>
      %cst_27 = arith.constant 1.562500e-02 : f32
      %43 = vector.broadcast %cst_27 : f32 to vector<1x1280xf32>
      %44 = arith.mulf %42, %43 : vector<1x1280xf32>
      %cst_28 = arith.constant 0.000000e+00 : f32
      %45 = vector.broadcast %cst_28 : f32 to vector<1x1280xf32>
      %46 = arith.maximumf %44, %45 : vector<1x1280xf32>
      %c0_29 = arith.constant 0 : index
      %c0_30 = arith.constant 0 : index
      %47 = vector.load %arg7[%c0_29, %c0_30] : memref<1280x10xf32, #tpu.memory_space<vmem>>, vector<1280x10xf32>
      %cst_31 = arith.constant dense<0.000000e+00> : vector<1x10xf32>
      %48 = tpu.matmul %46, %47, %cst_31 {dimension_numbers = #tpu.dot_dimension_numbers<[1], [0], [0], [1], [0, 0, 1, 1], [], []>} : vector<1x1280xf32>, vector<1280x10xf32>, vector<1x10xf32> -> vector<1x10xf32>
      %c0_32 = arith.constant 0 : index
      %c0_33 = arith.constant 0 : index
      %49 = vector.load %arg8[%c0_32, %c0_33] : memref<1x10xf32, #tpu.memory_space<vmem>>, vector<1x10xf32>
      %50 = arith.addf %48, %49 : vector<1x10xf32>
      %cst_34 = arith.constant dense<0xFF800000> : vector<1xf32>
      %51 = vector.multi_reduction <maximumf>, %50, %cst_34 [1] : vector<1x10xf32> to vector<1xf32>
      %52 = vector.shape_cast %51 : vector<1xf32> to vector<1x1xf32>
      %53 = vector.broadcast %52 : vector<1x1xf32> to vector<1x10xf32>
      %54 = arith.subf %50, %53 : vector<1x10xf32>
      %55 = math.exp %54 : vector<1x10xf32>
      %cst_35 = arith.constant dense<0.000000e+00> : vector<1xf32>
      %56 = vector.multi_reduction <add>, %55, %cst_35 [1] : vector<1x10xf32> to vector<1xf32>
      %57 = vector.shape_cast %56 : vector<1xf32> to vector<1x1xf32>
      %58 = tpu.reciprocal %57 : vector<1x1xf32> -> vector<1x1xf32>
      %59 = vector.broadcast %58 : vector<1x1xf32> to vector<1x10xf32>
      %60 = arith.mulf %55, %59 : vector<1x10xf32>
      %61 = vector.shape_cast %60 : vector<1x10xf32> to vector<1x1x10xf32>
      %c0_36 = arith.constant 0 : index
      %c0_37 = arith.constant 0 : index
      %c0_38 = arith.constant 0 : index
      %62 = vector.load %arg9[%c0_36, %c0_37, %c0_38] : memref<1x1x10xf32, #tpu.memory_space<vmem>>, vector<1x1x10xf32>
      tpu.vector_store %arg9[%c0_36, %c0_37, %c0_38], %61 {strides = array<i32>} : memref<1x1x10xf32, #tpu.memory_space<vmem>>, vector<1x1x10xf32>,
    } else {
    }
    return
  }
  func.func @transform_0(%arg0: i32, %arg1: i32) -> (i32, i32, i32) {
    %c0_i32 = arith.constant 0 : i32
    %c0_i32_0 = arith.constant 0 : i32
    return %arg0, %arg1, %c0_i32 : i32, i32, i32
  }
  func.func @transform_1(%arg0: i32, %arg1: i32) -> (i32, i32) {
    %c0_i32 = arith.constant 0 : i32
    %c0_i32_0 = arith.constant 0 : i32
    %c0_i32_1 = arith.constant 0 : i32
    return %c0_i32, %c0_i32_0 : i32, i32
  }
  func.func @transform_2(%arg0: i32, %arg1: i32) -> (i32, i32) {
    %c0_i32 = arith.constant 0 : i32
    %c0_i32_0 = arith.constant 0 : i32
    %c0_i32_1 = arith.constant 0 : i32
    return %c0_i32, %c0_i32_0 : i32, i32
  }
  func.func @transform_3(%arg0: i32, %arg1: i32) -> (i32, i32) {
    %c0_i32 = arith.constant 0 : i32
    %c0_i32_0 = arith.constant 0 : i32
    %c0_i32_1 = arith.constant 0 : i32
    return %c0_i32, %c0_i32_0 : i32, i32
  }
  func.func @transform_4(%arg0: i32, %arg1: i32) -> (i32, i32) {
    %c0_i32 = arith.constant 0 : i32
    %c0_i32_0 = arith.constant 0 : i32
    %c0_i32_1 = arith.constant 0 : i32
    return %c0_i32, %c0_i32_0 : i32, i32
  }
  func.func @transform_5(%arg0: i32, %arg1: i32) -> (i32, i32) {
    %c0_i32 = arith.constant 0 : i32
    %c0_i32_0 = arith.constant 0 : i32
    %c0_i32_1 = arith.constant 0 : i32
    return %c0_i32, %c0_i32_0 : i32, i32
  }
  func.func @transform_6(%arg0: i32, %arg1: i32) -> (i32, i32) {
    %c0_i32 = arith.constant 0 : i32
    %c0_i32_0 = arith.constant 0 : i32
    %c0_i32_1 = arith.constant 0 : i32
    return %c0_i32, %c0_i32_0 : i32, i32
  }
  func.func @transform_7(%arg0: i32, %arg1: i32) -> (i32, i32, i32) {
    %c0_i32 = arith.constant 0 : i32
    %c0_i32_0 = arith.constant 0 : i32
    %c0_i32_1 = arith.constant 0 : i32
    return %arg0, %c0_i32, %c0_i32_0 : i32, i32, i32
  }
}

</mosaic_0001>

<bundles_post_ra>
// kernel: nima_forward.1
= control target key start
LH: loop header
LB: loop body
LE: loop exit
PB: predicated region body
PF: predicated region fallthrough
CT: control target
= control target key end

     0   :  { %12 = vsyncpa [#allocation4], 0  ;;  %s3259_s0 = inlined_call_operand.vmem [shape: f32[2,64,32], index: 0, kind: input, shape index: {}]   ;;  %s3260_s1 = inlined_call_operand.vmem [shape: f32[32,32], index: 1, kind: input, shape index: {}]   ;;  %s3261_s2 = inlined_call_operand.vmem [shape: f32[1,32], index: 2, kind: input, shape index: {}]   ;;  %s3262_s3 = inlined_call_operand.vmem [shape: bf16[32,1280], index: 3, kind: input, shape index: {}]   ;;  %s3263_s4 = inlined_call_operand.vmem [shape: f32[1,1280], index: 4, kind: input, shape index: {}]   ;;  %s3264_s5 = inlined_call_operand.vmem [shape: f32[1280,10], index: 5, kind: input, shape index: {}]   ;;  %s3265_s6 = inlined_call_operand.vmem [shape: f32[1,10], index: 6, kind: input, shape index: {}]   ;;  %s3266_s7 = inlined_call_operand.hbm [shape: f32[2,1,10], index: 7, kind: output, shape index: {}]  }
   0x1   :  { %14 = vsyncpa [#allocation4 + $0x1], 0  ;;  %s2161_s24 = smov 0   ;;  %s2163_s25 = smov 0  }
   0x2   :  { %s2165_s26 = smov 0   ;;  %s2167_s27 = smov 0  }
   0x3   :  { %s2169_s28 = smov 0   ;;  %s2171_s29 = smov 0  }
   0x4 LB: > { %s1821_s30 = sadd.s32 4294967295, %s2118_s29   ;;  %s1822_s8 = sadd.s32 4294967294, %s2118_s29   ;;  %s2118_s29 = sphi %s2171_s29, %s20_s29   ;;  %s2114_s28 = sphi %s2169_s28, %s3275_s28   ;;  %s2110_s27 = sphi %s2167_s27, %s3274_s27   ;;  %s2106_s26 = sphi %s2165_s26, %s3273_s26   ;;  %s2102_s25 = sphi %s2163_s25, %s3272_s25   ;;  %s2098_s24 = sphi %s2161_s24, %s3271_s24  }
   0x5   : > { %s32_s9 = sadd.s32 1, %s2114_s28  ;;  %s193_s10 = sadd.s32 1, %s2106_s26 }
   0x6   : > { %p34_p0 = scmp.ge.s32.totalorder %s32_s9, 2  ;;  %p203_p1 = scmp.ne.s32.totalorder %s2106_s26, %s2102_s25 }
   0x7   : > { %p204_p2 = scmp.eq.s32.totalorder %s1821_s30, 1  ;;  %p209_p3 = scmp.ne.s32.totalorder %s2102_s25, %s2098_s24 }
   0x8   : > { %s3277_s9 = smov (%p34_p0, %s32_s9), 0  ;;  %p210_p5 = scmp.eq.s32.totalorder %s1822_s8, 1 }
   0x9   : > { %p2201_p4 = por %p204_p2, %p203_p1  ;;  %s190_s12 = ssub.s32 %s2114_s28, %s3277_s9 }
   0xa   : > { %p1825_p6 = scmp.ge.s32.totalorder %s2118_s29, 1  ;;  %p191_p7 = scmp.eq.s32.totalorder %s190_s12, 0 }
   0xb   : > { %p2208_p8 = por %p210_p5, %p209_p3  ;;  %p259_p9 = scmp.lt.s32.totalorder %s2118_s29, 3 }
   0xc   : > { %s2214_s14 = scalar_select %p191_p7, %s2106_s26, %s193_s10  }
   0xd   : > { %p260_p10 = pnand %p1825_p6, %p259_p9 }
   0xe   : > { %p295_p11 = scmp.lt.s32.totalorder (!%p260_p10), %s2110_s27, 1  ;;  %s292_s20 = sand.u32 (!%p260_p10), 1, %s2102_s25  }
   0xf   : > { %263 = sbr.rel (%p260_p10) target bundleno = 928 (0x3a0), region = 48  ;;  %s1748_s23 = scalar_lea.hbm (!%p260_p10), %s3266_s7, %s2110_s27 }
  0x10   : > { %s1752_s10 = sshll.u32 (!%p260_p10), %s1748_s23, 4  ;;  %s2060_s18 = scalar_lea.hbm (!%p260_p10), %s3266_s7, 2  ;;  %s1753_s10 = int_to_ptr.hbm [resolvable:$true] %s1752_s10 }
  0x11   : > { %s2054_s15 = sshra.s32 (!%p260_p10), %s1753_s10, 4  ;;  %s2055_s15 = int_to_ptr.hbm [resolvable:$true] %s2054_s15 }
  0x12   : > { %p2061_p1 = scmp.lt.s32.totalorder (!%p260_p10), %s2055_s15, %s3266_s7 }
  0x14   : > { %v326_v0 = vld [vmem:[%s3260_s1 + $0x18] sm:$0xff]  ;;  %v325_v1 = vld [vmem:[%s3260_s1 + $0x10] sm:$0xff]  ;;  %v324_v2 = vld [vmem:[%s3260_s1 + $0x8] sm:$0xff]  ;;  %s296_s21 = scalar_select %p295_p11, %s2110_s27, 1  ;;  %vm331_vm0 = vcmask 261120   ;;  %vm1296_vm1 = vcmask 1040384  }
  0x15   : > { %368 = vmatpush.msra.mxu0 %v326_v0  ;;  %v323_v3 = vld [vmem:[%s3260_s1] sm:$0xff]  ;;  %v1970_v8 = vld [vmem:[%s3262_s3 + $0x5c] sm:$0xf]  ;;  %v1878_v15 = vld [vmem:[%s3262_s3 + $0x50] sm:$0xf]  ;;  %vm1298_vm2 = vcmask 1042434  }
  0x16   : > { %s1958_s30 = sshll.u32 %s296_s21, 6  ;;  %v1888_v9 = vld [vmem:[%s3262_s3 + $0x80] sm:$0xf0]  ;;  %v1974_v16 = vld [vmem:[%s3262_s3 + $0x74] sm:$0xf0]  ;;  %vm1300_vm3 = vcmask 1041408  }
  0x17   : > { %369 = vmatpush.msra.mxu0 %v325_v1  ;;  %s302_s12 = scalar_lea.vmem %s3259_s0, %s1958_s30  ;;  %v1891_v10 = vor.u32 %v1970_v8, %v1888_v9  ;;  %v1969_v17 = vld [vmem:[%s3262_s3 + $0x54] sm:$0xf]  ;;  %v1879_v18 = vor.u32 %v1974_v16, %v1878_v15  ;;  %v1880_v19 = vld [vmem:[%s3262_s3 + $0x78] sm:$0xf0]  ;;  %v1886_v20 = vld [vmem:[%s3262_s3 + $0x58] sm:$0xf] }
  0x18   : > { %v315_v4 = vld [vmem:[%s302_s12] sm:$0xff]  ;;  %v316_v5 = vld [vmem:[%s302_s12 + $0x8] sm:$0xff]  ;;  %v317_v6 = vld [vmem:[%s302_s12 + $0x10] sm:$0xff]  ;;  %v1883_v22 = vor.u32 %v1969_v17, %v1880_v19  ;;  %vm1302_vm4 = vcmask 1044484   ;;  %vm1304_vm5 = vcmask 1046534   ;;  %vm1306_vm6 = vcmask 1045508  }
  0x19   : > { %370 = vmatpush.msra.mxu0 %v324_v2  ;;  %v318_v7 = vld [vmem:[%s302_s12 + $0x18] sm:$0xff]  ;;  %v319_v11 = vld [vmem:[%s302_s12 + $0x20] sm:$0xff]  ;;  %v320_v12 = vld [vmem:[%s302_s12 + $0x28] sm:$0xff]  ;;  %579 = vmatpush.bf16.msra.mxu1 %v1879_v18  ;;  %vm1308_vm7 = vcmask 1043456   ;;  %vm1713_vm9 = vcmask 73728   ;;  %s293_s30 = scalar_lea.vmem [#allocation3], %s292_s20 }
  0x1a   : > { %v321_v13 = vld [vmem:[%s302_s12 + $0x30] sm:$0xff]  ;;  %v322_v14 = vld [vmem:[%s302_s12 + $0x38] sm:$0xff]  ;;  %v1975_v21 = vld [vmem:[%s3262_s3 + $0x7c] sm:$0xf0]  ;;  %608 = vmatpush.bf16.msra.mxu2 %v1883_v22  ;;  %s1750_s8 = sshll.u32 %s293_s30, 4  ;;  %s1740_s12 = scalar_lea.sflag [#allocation4], %s292_s20  ;;  %s1751_s8 = int_to_ptr.vmem [resolvable:$true] %s1750_s8 }
  0x1b   : > { %371 = vmatpush.msra.mxu0 %v323_v3  ;;  %v1887_v23 = vor.u32 %v1975_v21, %v1886_v20  ;;  %v1838_v24 = vld [vmem:[%s3262_s3] sm:$0xf]  ;;  %v1964_v25 = vld [vmem:[%s3262_s3 + $0x24] sm:$0xf0]  ;;  %v1959_v26 = vld [vmem:[%s3262_s3 + $0x4] sm:$0xf] }
  0x1c   : > { %1828 = vmatmul.msk.f32.vlgmr.msra.gmra.mxu0 %vm331_vm0, %v315_v4  ;;  %v1839_v27 = vor.u32 %v1964_v25, %v1838_v24  ;;  %v1840_v28 = vld [vmem:[%s3262_s3 + $0x28] sm:$0xf0]  ;;  %v1846_v29 = vld [vmem:[%s3262_s3 + $0x8] sm:$0xf]  ;;  %v1965_v30 = vld [vmem:[%s3262_s3 + $0x2c] sm:$0xf0] }
  0x1d   : > { %666 = vmatpush.bf16.msrb.mxu0 %v1891_v10  ;;  %637 = vmatpush.bf16.msra.mxu3 %v1887_v23  ;;  %v1843_v31 = vor.u32 %v1959_v26, %v1840_v28  ;;  %v1847_v32 = vor.u32 %v1965_v30, %v1846_v29  ;;  %v1960_v33 = vld [vmem:[%s3262_s3 + $0xc] sm:$0xf]  ;;  %v1848_v34 = vld [vmem:[%s3262_s3 + $0x30] sm:$0xf0]  ;;  %v1971_v36 = vld [vmem:[%s3262_s3 + $0x64] sm:$0xf] }
  0x1e   : > { %580 = vmatpush.bf16.msra.mxu1 %v1839_v27  ;;  %v1851_v35 = vor.u32 %v1960_v33, %v1848_v34  ;;  %v1896_v37 = vld [vmem:[%s3262_s3 + $0x88] sm:$0xf0]  ;;  %v1894_v39 = vld [vmem:[%s3262_s3 + $0x60] sm:$0xf]  ;;  %v1976_v40 = vld [vmem:[%s3262_s3 + $0x84] sm:$0xf0] }
  0x1f   : > { %609 = vmatpush.bf16.msra.mxu2 %v1843_v31  ;;  %v1899_v38 = vor.u32 %v1971_v36, %v1896_v37  ;;  %v1895_v42 = vor.u32 %v1976_v40, %v1894_v39  ;;  %v2304_v43 = vld [vmem:[%s3261_s2] ss:$0 sm:$0xff]  ;;  %v1902_v52 = vld [vmem:[%s3262_s3 + $0x68] sm:$0xf]  ;;  %v1977_v53 = vld [vmem:[%s3262_s3 + $0x8c] sm:$0xf0] }
  0x20   : > { %v1903_v55 = vor.u32 %v1977_v53, %v1902_v52  ;;  %v1972_v57 = vld [vmem:[%s3262_s3 + $0x6c] sm:$0xf]  ;;  %v1904_v58 = vld [vmem:[%s3262_s3 + $0x90] sm:$0xf0]  ;;  %v1856_v61 = vld [vmem:[%s3262_s3 + $0x38] sm:$0xf0] }
  0x21   : > { %638 = vmatpush.bf16.msra.mxu3 %v1847_v32  ;;  %667 = vmatpush.bf16.msrb.mxu0 %v1851_v35  ;;  %v1907_v59 = vor.u32 %v1972_v57, %v1904_v58  ;;  %v1961_v60 = vld [vmem:[%s3262_s3 + $0x14] sm:$0xf]  ;;  %v1862_v10 = vld [vmem:[%s3262_s3 + $0x18] sm:$0xf]  ;;  %v1912_v26 = vld [vmem:[%s3262_s3 + $0x98] sm:$0xf0] }
  0x22   : > { %695 = vmatpush.bf16.msrb.mxu1 %v1895_v42  ;;  %v1859_v62 = vor.u32 %v1961_v60, %v1856_v61  ;;  %v1973_v25 = vld [vmem:[%s3262_s3 + $0x74] sm:$0xf]  ;;  %v1910_v27 = vld [vmem:[%s3262_s3 + $0x70] sm:$0xf]  ;;  %v1978_v29 = vld [vmem:[%s3262_s3 + $0x94] sm:$0xf0] }
  0x23   : > { %724 = vmatpush.bf16.msrb.mxu2 %v1899_v38  ;;  %v1915_v28 = vor.u32 %v1973_v25, %v1912_v26  ;;  %v1911_v30 = vor.u32 %v1978_v29, %v1910_v27  ;;  %v1963_v39 = vld [vmem:[%s3262_s3 + $0x24] sm:$0xf]  ;;  %v1872_v40 = vld [vmem:[%s3262_s3 + $0x48] sm:$0xf0]  ;;  %s2056_s27 = scalar_lea.hbm %s2055_s15, 1 }
  0x24   : > { %1829 = vmatmul.msk.f32.gmra.mxu0 %vm331_vm0, %v316_v5  ;;  %v1875_v42 = vor.u32 %v1963_v39, %v1872_v40  ;;  %p2057_p12 = scmp.ne.s32.totalorder %s2055_s15, %s2056_s27  ;;  %p2062_p2 = scmp.lt.s32.totalorder %s2060_s18, %s2056_s27 }
  0x25   : > { %753 = vmatpush.bf16.msrb.mxu3 %v1903_v55  ;;  %782 = vmatpush.bf16.msra.mxu0 %v1907_v59 }
  0x26   : > { %p2058_p13 = pnand %p2057_p12, %p2201_p4  ;;  %p2063_p3 = por %p2062_p2, %p2061_p1 }
  0x27   : > { %725 = vmatpush.bf16.msrb.mxu2 %v1859_v62 }
  0x28   : > { %p2059_p0 = pneg %p2058_p13 }
  0x2a   : > { %p2064_p5 = pnand %p2063_p3, %p2059_p0 }
  0x2c   : > { %1830 = vmatmul.msk.f32.gmra.mxu0 %vm331_vm0, %v317_v6  ;;  %v1854_v6 = vld [vmem:[%s3262_s3 + $0x10] sm:$0xf] }
  0x34   : > { %1831 = vmatmul.msk.f32.gmra.mxu0 %vm331_vm0, %v318_v7  ;;  %v1966_v7 = vld [vmem:[%s3262_s3 + $0x34] sm:$0xf0] }
  0x35   : > { %v1855_v9 = vor.u32 %v1966_v7, %v1854_v6 }
  0x37   : > { %696 = vmatpush.bf16.msrb.mxu1 %v1855_v9 }
  0x3c   : > { %1832 = vmatmul.msk.f32.gmra.mxu0 %vm331_vm0, %v319_v11  ;;  %v1967_v11 = vld [vmem:[%s3262_s3 + $0x3c] sm:$0xf0] }
  0x44   : > { %1833 = vmatmul.msk.f32.gmra.mxu0 %vm331_vm0, %v320_v12  ;;  %v1962_v12 = vld [vmem:[%s3262_s3 + $0x1c] sm:$0xf] }
  0x4c   : > { %1834 = vmatmul.msk.f32.gmra.mxu0 %vm331_vm0, %v321_v13  ;;  %v1863_v13 = vor.u32 %v1967_v11, %v1862_v10 }
  0x4e   : > { %754 = vmatpush.bf16.msrb.mxu3 %v1863_v13 }
  0x54   : > { %1835 = vmatmul.msk.f32.gmra.mxu0 %vm331_vm0, %v322_v14  ;;  %v1864_v14 = vld [vmem:[%s3262_s3 + $0x40] sm:$0xf0] }
  0x55   : > { %v1867_v15 = vor.u32 %v1962_v12, %v1864_v14 }
  0x57   : > { %783 = vmatpush.bf16.msra.mxu0 %v1867_v15 }
  0x99   : > { %v373_v41 = vpop.f32.mrf.mxu0 }
  0x9a   : > { %v374_v44 = vadd.f32 %v2304_v43, %v373_v41  ;;  %v1870_v41 = vld [vmem:[%s3262_s3 + $0x20] sm:$0xf] }
  0x9c   : > { %v397_v46 = vmax.f32 %v374_v44, 0.0 }
  0x9e   : > { %v405_v49 = vmin.f32 %v397_v46, 6.0 }
  0xa1   : > { %v376_v45 = vpop.f32.mrf.mxu0 }
  0xa2   : > { %v377_v47 = vadd.f32 %v2304_v43, %v376_v45  ;;  %v2449_v45 = vld [vmem:[%s3263_s4] sm:$0xff] }
  0xa3   : > { %v2460_v53 = vperm.slane %v2449_v45, 2  ;;  %v2465_v60 = vperm.slane %v2449_v45, 0  ;;  %v2473_v11 = vperm.slane %v2449_v45, 1 }
  0xa4   : > { %v398_v48 = vmax.f32 %v377_v47, 0.0 }
  0xa6   : > { %v406_v50 = vmin.f32 %v398_v48, 6.0  ;;  %v2452_v48 = vperm.slane %v2449_v45, 3 }
  0xa8   : > { %v2308_v51 = vpack.c.bf16 %v406_v50, %v405_v49 }
  0xa9   : > { %v379_v54 = vpop.f32.mrf.mxu0 }
  0xaa   : > { %1916 = vmatmul.msk.bf16.vlgmr.msra.gmra.mxu1 %vm331_vm0, %v2308_v51  ;;  %1920 = vmatmul.msk.bf16.vlgmr.msra.gmra.mxu2 %vm331_vm0, %v2308_v51  ;;  %v380_v56 = vadd.f32 %v2304_v43, %v379_v54 }
  0xab   : > { %1924 = vmatmul.msk.bf16.vlgmr.msra.gmra.mxu3 %vm331_vm0, %v2308_v51  ;;  %1928 = vmatmul.msk.bf16.vlgmr.msrb.gmra.mxu0 %vm331_vm0, %v2308_v51 }
  0xac   : > { %v399_v0 = vmax.f32 %v380_v56, 0.0  ;;  %840 = vmatpush.bf16.msra.mxu2 %v1915_v28  ;;  %811 = vmatpush.bf16.msra.mxu1 %v1911_v30 }
  0xae   : > { %v407_v3 = vmin.f32 %v399_v0, 6.0 }
  0xb0   : > { %841 = vmatpush.bf16.msra.mxu2 %v1875_v42 }
  0xb1   : > { %v382_v63 = vpop.f32.mrf.mxu0 }
  0xb2   : > { %v383_v1 = vadd.f32 %v2304_v43, %v382_v63 }
  0xb4   : > { %v400_v2 = vmax.f32 %v383_v1, 0.0 }
  0xb6   : > { %v408_v4 = vmin.f32 %v400_v2, 6.0 }
  0xb8   : > { %v2338_v5 = vpack.c.bf16 %v408_v4, %v407_v3 }
  0xb9   : > { %v385_v8 = vpop.f32.mrf.mxu0 }
  0xba   : > { %1917 = vmatmul.msk.bf16.gmra.mxu1 %vm331_vm0, %v2338_v5  ;;  %1921 = vmatmul.msk.bf16.gmra.mxu2 %vm331_vm0, %v2338_v5  ;;  %v386_v16 = vadd.f32 %v2304_v43, %v385_v8 }
  0xbb   : > { %1925 = vmatmul.msk.bf16.gmra.mxu3 %vm331_vm0, %v2338_v5  ;;  %1929 = vmatmul.msk.bf16.gmra.mxu0 %vm331_vm0, %v2338_v5 }
  0xbc   : > { %v401_v18 = vmax.f32 %v386_v16, 0.0 }
  0xbe   : > { %v409_v21 = vmin.f32 %v401_v18, 6.0 }
  0xc1   : > { %v388_v17 = vpop.f32.mrf.mxu0 }
  0xc2   : > { %v389_v19 = vadd.f32 %v2304_v43, %v388_v17 }
  0xc4   : > { %v402_v20 = vmax.f32 %v389_v19, 0.0 }
  0xc6   : > { %v410_v22 = vmin.f32 %v402_v20, 6.0 }
  0xc8   : > { %v2368_v23 = vpack.c.bf16 %v410_v22, %v409_v21 }
  0xc9   : > { %v391_v24 = vpop.f32.mrf.mxu0 }
  0xca   : > { %1918 = vmatmul.msk.bf16.gmra.mxu1 %vm331_vm0, %v2368_v23  ;;  %1922 = vmatmul.msk.bf16.gmra.mxu2 %vm331_vm0, %v2368_v23  ;;  %v392_v31 = vadd.f32 %v2304_v43, %v391_v24 }
  0xcb   : > { %1926 = vmatmul.msk.bf16.gmra.mxu3 %vm331_vm0, %v2368_v23  ;;  %1930 = vmatmul.msk.bf16.gmra.mxu0 %vm331_vm0, %v2368_v23 }
  0xcc   : > { %v403_v33 = vmax.f32 %v392_v31, 0.0 }
  0xce   : > { %v411_v36 = vmin.f32 %v403_v33, 6.0 }
  0xd1   : > { %v394_v32 = vpop.f32.mrf.mxu0 }
  0xd2   : > { %v395_v34 = vadd.f32 %v2304_v43, %v394_v32  ;;  %v1968_v43 = vld [vmem:[%s3262_s3 + $0x44] sm:$0xf0] }
  0xd3   : > { %v1871_v44 = vor.u32 %v1968_v43, %v1870_v41 }
  0xd4   : > { %v404_v35 = vmax.f32 %v395_v34, 0.0 }
  0xd5   : > { %812 = vmatpush.bf16.msra.mxu1 %v1871_v44 }
  0xd6   : > { %v412_v37 = vmin.f32 %v404_v35, 6.0 }
  0xd8   : > { %v2392_v38 = vpack.c.bf16 %v412_v37, %v411_v36 }
  0xda   : > { %1919 = vmatmul.msk.bf16.gmra.mxu1 %vm331_vm0, %v2392_v38  ;;  %1923 = vmatmul.msk.bf16.gmra.mxu2 %vm331_vm0, %v2392_v38 }
  0xdb   : > { %1927 = vmatmul.msk.bf16.gmra.mxu3 %vm331_vm0, %v2392_v38  ;;  %1931 = vmatmul.msk.bf16.gmra.mxu0 %vm331_vm0, %v2392_v38 }
  0xea   : > { %1932 = vmatmul.msk.bf16.vlgmr.msrb.gmra.mxu1 %vm331_vm0, %v2308_v51  ;;  %1936 = vmatmul.msk.bf16.vlgmr.msrb.gmra.mxu2 %vm331_vm0, %v2308_v51 }
  0xeb   : > { %1940 = vmatmul.msk.bf16.vlgmr.msrb.gmra.mxu3 %vm331_vm0, %v2308_v51  ;;  %1944 = vmatmul.msk.bf16.vlgmr.msra.gmra.mxu0 %vm331_vm0, %v2308_v51 }
  0xfa   : > { %1933 = vmatmul.msk.bf16.gmra.mxu1 %vm331_vm0, %v2338_v5  ;;  %1937 = vmatmul.msk.bf16.gmra.mxu2 %vm331_vm0, %v2338_v5 }
  0xfb   : > { %1941 = vmatmul.msk.bf16.gmra.mxu3 %vm331_vm0, %v2338_v5  ;;  %1945 = vmatmul.msk.bf16.gmra.mxu0 %vm331_vm0, %v2338_v5 }
 0x10a   : > { %1934 = vmatmul.msk.bf16.gmra.mxu1 %vm331_vm0, %v2368_v23  ;;  %1938 = vmatmul.msk.bf16.gmra.mxu2 %vm331_vm0, %v2368_v23 }
 0x10b   : > { %1942 = vmatmul.msk.bf16.gmra.mxu3 %vm331_vm0, %v2368_v23  ;;  %1946 = vmatmul.msk.bf16.gmra.mxu0 %vm331_vm0, %v2368_v23 }
 0x11a   : > { %1935 = vmatmul.msk.bf16.gmra.mxu1 %vm331_vm0, %v2392_v38  ;;  %1939 = vmatmul.msk.bf16.gmra.mxu2 %vm331_vm0, %v2392_v38 }
 0x11b   : > { %1943 = vmatmul.msk.bf16.gmra.mxu3 %vm331_vm0, %v2392_v38  ;;  %1947 = vmatmul.msk.bf16.gmra.mxu0 %vm331_vm0, %v2392_v38 }
 0x127   : > { %v582_v46 = vpop.f32.mrf.mxu1 }
 0x128   : > { %v669_v47 = vpop.f32.mrf.mxu0  ;;  %v583_v6 = vadd.f32 %v582_v46, %v2465_v60 }
 0x129   : > { %v670_v49 = vadd.f32 %v669_v47, %v2452_v48 }
 0x12a   : > { %1948 = vmatmul.msk.bf16.vlgmr.msra.gmra.mxu1 %vm331_vm0, %v2308_v51  ;;  %1952 = vmatmul.msk.bf16.vlgmr.msra.gmra.mxu2 %vm331_vm0, %v2308_v51  ;;  %v863_v16 = vmax.f32 %v583_v6, 0.0 }
 0x12b   : > { %v866_v56 = vmax.f32 %v670_v49, 0.0 }
 0x12c   : > { %v943_v29 = vmin.f32 %v863_v16, 6.0 }
 0x12d   : > { %v611_v50 = vpop.f32.mrf.mxu2  ;;  %v946_v61 = vmin.f32 %v866_v56, 6.0 }
 0x12e   : > { %v640_v52 = vpop.f32.mrf.mxu3  ;;  %v612_v22 = vadd.f32 %v611_v50, %v2473_v11 }
 0x12f   : > { %v584_v54 = vpop.f32.mrf.mxu1  ;;  %v641_v58 = vadd.f32 %v640_v52, %v2460_v53 }
 0x130   : > { %v671_v55 = vpop.f32.mrf.mxu0  ;;  %v585_v63 = vadd.f32 %v584_v54, %v2465_v60  ;;  %v864_v36 = vmax.f32 %v612_v22, 0.0 }
 0x131   : > { %v672_v57 = vadd.f32 %v671_v55, %v2452_v48  ;;  %v865_v1 = vmax.f32 %v641_v58, 0.0 }
 0x132   : > { %v873_v12 = vmax.f32 %v585_v63, 0.0  ;;  %v944_v52 = vmin.f32 %v864_v36, 6.0 }
 0x133   : > { %v876_v59 = vmax.f32 %v672_v57, 0.0  ;;  %v945_v13 = vmin.f32 %v865_v1, 6.0 }
 0x134   : > { %v953_v24 = vmin.f32 %v873_v12, 6.0 }
 0x135   : > { %v956_v51 = vmin.f32 %v876_v59, 6.0  ;;  %v613_v62 = vpop.f32.mrf.mxu2 }
 0x136   : > { %v642_v0 = vpop.f32.mrf.mxu3  ;;  %v614_v17 = vadd.f32 %v613_v62, %v2473_v11  ;;  %v1148_v37 = vadd.f32 %v953_v24, %v943_v29 }
 0x137   : > { %v1187_v2 = vadd.f32 %v956_v51, %v946_v61  ;;  %v643_v3 = vadd.f32 %v642_v0, %v2460_v53  ;;  %v587_v4 = vpop.f32.mrf.mxu1 }
 0x138   : > { %v588_v7 = vadd.f32 %v587_v4, %v2465_v60  ;;  %v674_v8 = vpop.f32.mrf.mxu0  ;;  %v874_v30 = vmax.f32 %v614_v17, 0.0 }
 0x139   : > { %v875_v9 = vmax.f32 %v643_v3, 0.0  ;;  %v675_v10 = vadd.f32 %v674_v8, %v2452_v48 }
 0x13a   : > { %1949 = vmatmul.msk.bf16.gmra.mxu1 %vm331_vm0, %v2338_v5  ;;  %1953 = vmatmul.msk.bf16.gmra.mxu2 %vm331_vm0, %v2338_v5  ;;  %v883_v18 = vmax.f32 %v588_v7, 0.0  ;;  %v954_v43 = vmin.f32 %v874_v30, 6.0 }
 0x13b   : > { %v955_v14 = vmin.f32 %v875_v9, 6.0  ;;  %v886_v15 = vmax.f32 %v675_v10, 0.0 }
 0x13c   : > { %v963_v31 = vmin.f32 %v883_v18, 6.0  ;;  %v1161_v51 = vadd.f32 %v954_v43, %v944_v52 }
 0x13d   : > { %v1174_v19 = vadd.f32 %v955_v14, %v945_v13  ;;  %v966_v20 = vmin.f32 %v886_v15, 6.0  ;;  %v616_v21 = vpop.f32.mrf.mxu2 }
 0x13e   : > { %v617_v25 = vadd.f32 %v616_v21, %v2473_v11  ;;  %v645_v26 = vpop.f32.mrf.mxu3  ;;  %v1149_v44 = vadd.f32 %v1148_v37, %v963_v31 }
 0x13f   : > { %v1188_v27 = vadd.f32 %v1187_v2, %v966_v20  ;;  %v646_v28 = vadd.f32 %v645_v26, %v2460_v53  ;;  %v589_v5 = vpop.f32.mrf.mxu1 }
 0x140   : > { %v590_v32 = vadd.f32 %v589_v5, %v2465_v60  ;;  %v676_v33 = vpop.f32.mrf.mxu0  ;;  %v884_v39 = vmax.f32 %v617_v25, 0.0 }
 0x141   : > { %v885_v34 = vmax.f32 %v646_v28, 0.0  ;;  %v677_v35 = vadd.f32 %v676_v33, %v2452_v48 }
 0x142   : > { %v893_v40 = vmax.f32 %v590_v32, 0.0  ;;  %v964_v54 = vmin.f32 %v884_v39, 6.0 }
 0x143   : > { %v965_v41 = vmin.f32 %v885_v34, 6.0  ;;  %v896_v42 = vmax.f32 %v677_v35, 0.0 }
 0x144   : > { %v973_v46 = vmin.f32 %v893_v40, 6.0  ;;  %v1162_v3 = vadd.f32 %v1161_v51, %v964_v54 }
 0x145   : > { %v1175_v47 = vadd.f32 %v1174_v19, %v965_v41  ;;  %v976_v49 = vmin.f32 %v896_v42, 6.0  ;;  %v618_v50 = vpop.f32.mrf.mxu2 }
 0x146   : > { %v1150_v55 = vadd.f32 %v1149_v44, %v973_v46  ;;  %v619_v56 = vadd.f32 %v618_v50, %v2473_v11  ;;  %v647_v57 = vpop.f32.mrf.mxu3 }
 0x147   : > { %v1189_v58 = vadd.f32 %v1188_v27, %v976_v49  ;;  %v648_v59 = vadd.f32 %v647_v57, %v2460_v53  ;;  %v592_v61 = vpop.f32.mrf.mxu1 }
 0x148   : > { %v894_v62 = vmax.f32 %v619_v56, 0.0  ;;  %v593_v63 = vadd.f32 %v592_v61, %v2465_v60  ;;  %v679_v0 = vpop.f32.mrf.mxu0 }
 0x149   : > { %v895_v1 = vmax.f32 %v648_v59, 0.0  ;;  %v680_v2 = vadd.f32 %v679_v0, %v2452_v48 }
 0x14a   : > { %v974_v4 = vmin.f32 %v894_v62, 6.0  ;;  %v903_v6 = vmax.f32 %v593_v63, 0.0  ;;  %1950 = vmatmul.msk.bf16.gmra.mxu1 %vm331_vm0, %v2368_v23  ;;  %1954 = vmatmul.msk.bf16.gmra.mxu2 %vm331_vm0, %v2368_v23 }
 0x14b   : > { %v975_v7 = vmin.f32 %v895_v1, 6.0  ;;  %v906_v8 = vmax.f32 %v680_v2, 0.0 }
 0x14c   : > { %v1163_v9 = vadd.f32 %v1162_v3, %v974_v4  ;;  %v983_v10 = vmin.f32 %v903_v6, 6.0 }
 0x14d   : > { %v1176_v12 = vadd.f32 %v1175_v47, %v975_v7  ;;  %v986_v13 = vmin.f32 %v906_v8, 6.0  ;;  %v621_v14 = vpop.f32.mrf.mxu2 }
 0x14e   : > { %v1151_v15 = vadd.f32 %v1150_v55, %v983_v10  ;;  %v622_v16 = vadd.f32 %v621_v14, %v2473_v11  ;;  %v650_v17 = vpop.f32.mrf.mxu3 }
 0x14f   : > { %v1190_v18 = vadd.f32 %v1189_v58, %v986_v13  ;;  %v651_v19 = vadd.f32 %v650_v17, %v2460_v53  ;;  %v594_v20 = vpop.f32.mrf.mxu1 }
 0x150   : > { %v904_v21 = vmax.f32 %v622_v16, 0.0  ;;  %v595_v22 = vadd.f32 %v594_v20, %v2465_v60  ;;  %v681_v24 = vpop.f32.mrf.mxu0 }
 0x151   : > { %v905_v23 = vmax.f32 %v651_v19, 0.0  ;;  %v682_v25 = vadd.f32 %v681_v24, %v2452_v48 }
 0x152   : > { %v984_v26 = vmin.f32 %v904_v21, 6.0  ;;  %v913_v27 = vmax.f32 %v595_v22, 0.0 }
 0x153   : > { %v985_v28 = vmin.f32 %v905_v23, 6.0  ;;  %v916_v5 = vmax.f32 %v682_v25, 0.0  ;;  %v1345_v25 = vld [vmem:[%s3264_s5 + $0x78] sm:$0xff] }
 0x154   : > { %v1164_v29 = vadd.f32 %v1163_v9, %v984_v26  ;;  %v993_v30 = vmin.f32 %v913_v27, 6.0  ;;  %1513 = vmatpush.msra.mxu3 %v1345_v25 }
 0x155   : > { %v1177_v31 = vadd.f32 %v1176_v12, %v985_v28  ;;  %v996_v32 = vmin.f32 %v916_v5, 6.0  ;;  %v623_v33 = vpop.f32.mrf.mxu2 }
 0x156   : > { %v1152_v34 = vadd.f32 %v1151_v15, %v993_v30  ;;  %v624_v35 = vadd.f32 %v623_v33, %v2473_v11  ;;  %v652_v36 = vpop.f32.mrf.mxu3 }
 0x157   : > { %v1191_v37 = vadd.f32 %v1190_v18, %v996_v32  ;;  %v653_v39 = vadd.f32 %v652_v36, %v2460_v53  ;;  %v597_v40 = vpop.f32.mrf.mxu1  ;;  %v1343_v32 = vld [vmem:[%s3264_s5 + $0x68] sm:$0xff] }
 0x158   : > { %v914_v41 = vmax.f32 %v624_v35, 0.0  ;;  %v598_v42 = vadd.f32 %v597_v40, %v2465_v60  ;;  %v684_v43 = vpop.f32.mrf.mxu0  ;;  %v1342_v40 = vld [vmem:[%s3264_s5 + $0x60] sm:$0xff] }
 0x159   : > { %v915_v44 = vmax.f32 %v653_v39, 0.0  ;;  %v685_v46 = vadd.f32 %v684_v43, %v2452_v48 }
 0x15a   : > { %v994_v47 = vmin.f32 %v914_v41, 6.0  ;;  %v923_v49 = vmax.f32 %v598_v42, 0.0  ;;  %1951 = vmatmul.msk.bf16.gmra.mxu1 %vm331_vm0, %v2392_v38  ;;  %1955 = vmatmul.msk.bf16.gmra.mxu2 %vm331_vm0, %v2392_v38 }
 0x15b   : > { %v995_v50 = vmin.f32 %v915_v44, 6.0  ;;  %v926_v52 = vmax.f32 %v685_v46, 0.0  ;;  %v1341_v44 = vld [vmem:[%s3264_s5 + $0x58] sm:$0xff] }
 0x15c   : > { %v1165_v54 = vadd.f32 %v1164_v29, %v994_v47  ;;  %v1003_v55 = vmin.f32 %v923_v49, 6.0  ;;  %v1377_v46 = vld [vmem:[%s3264_s5 + $0x178] sm:$0xff] }
 0x15d   : > { %v1178_v56 = vadd.f32 %v1177_v31, %v995_v50  ;;  %v1006_v57 = vmin.f32 %v926_v52, 6.0  ;;  %v626_v58 = vpop.f32.mrf.mxu2  ;;  %v1393_v47 = vld [vmem:[%s3264_s5 + $0x1f8] sm:$0xff]  ;;  %1553 = vmatpush.msrb.mxu0 %v1377_v46 }
 0x15e   : > { %v1153_v59 = vadd.f32 %v1152_v34, %v1003_v55  ;;  %v627_v61 = vadd.f32 %v626_v58, %v2473_v11  ;;  %v655_v51 = vpop.f32.mrf.mxu3  ;;  %1573 = vmatpush.msrb.mxu1 %v1393_v47  ;;  %v1340_v55 = vld [vmem:[%s3264_s5 + $0x50] sm:$0xff]  ;;  %v1331_v47 = vld [vmem:[%s3264_s5 + $0x8] sm:$0xff] }
 0x15f   : > { %v1192_v62 = vadd.f32 %v1191_v37, %v1006_v57  ;;  %v656_v63 = vadd.f32 %v655_v51, %v2460_v53  ;;  %v599_v0 = vpop.f32.mrf.mxu1  ;;  %v1392_v57 = vld [vmem:[%s3264_s5 + $0x1f0] sm:$0xff]  ;;  %v1339_v51 = vld [vmem:[%s3264_s5 + $0x48] sm:$0xff] }
 0x160   : > { %v924_v1 = vmax.f32 %v627_v61, 0.0  ;;  %v600_v2 = vadd.f32 %v599_v0, %v2465_v60  ;;  %v686_v3 = vpop.f32.mrf.mxu0  ;;  %1574 = vmatpush.msrb.mxu1 %v1392_v57 }
 0x161   : > { %v925_v38 = vmax.f32 %v656_v63, 0.0  ;;  %v687_v4 = vadd.f32 %v686_v3, %v2452_v48  ;;  %v1391_v63 = vld [vmem:[%s3264_s5 + $0x1e8] sm:$0xff] }
 0x162   : > { %v1004_v6 = vmin.f32 %v924_v1, 6.0  ;;  %v933_v7 = vmax.f32 %v600_v2, 0.0  ;;  %1575 = vmatpush.msrb.mxu1 %v1391_v63  ;;  %v1361_v63 = vld [vmem:[%s3264_s5 + $0xf8] sm:$0xff] }
 0x163   : > { %v1005_v8 = vmin.f32 %v925_v38, 6.0  ;;  %v936_v9 = vmax.f32 %v687_v4, 0.0 }
 0x164   : > { %v1166_v10 = vadd.f32 %v1165_v54, %v1004_v6  ;;  %v1013_v12 = vmin.f32 %v933_v7, 6.0  ;;  %v1338_v6 = vld [vmem:[%s3264_s5 + $0x40] sm:$0xff] }
 0x165   : > { %v1179_v13 = vadd.f32 %v1178_v56, %v1005_v8  ;;  %v1016_v14 = vmin.f32 %v936_v9, 6.0  ;;  %v628_v15 = vpop.f32.mrf.mxu2  ;;  %v1376_v56 = vld [vmem:[%s3264_s5 + $0x170] sm:$0xff]  ;;  %v1374_v7 = vld [vmem:[%s3264_s5 + $0x160] sm:$0xff] }
 0x166   : > { %v1154_v16 = vadd.f32 %v1153_v59, %v1013_v12  ;;  %v629_v17 = vadd.f32 %v628_v15, %v2473_v11  ;;  %v657_v18 = vpop.f32.mrf.mxu3  ;;  %1554 = vmatpush.msrb.mxu0 %v1376_v56  ;;  %v1390_v8 = vld [vmem:[%s3264_s5 + $0x1e0] sm:$0xff]  ;;  %v1389_v15 = vld [vmem:[%s3264_s5 + $0x1d8] sm:$0xff]  ;;  %v2667_v56 = vperm.slane %v2449_v45, 6 }
 0x167   : > { %v1193_v19 = vadd.f32 %v1192_v62, %v1016_v14  ;;  %v658_v60 = vadd.f32 %v657_v18, %v2460_v53  ;;  %v2511_v20 = vpop.f32.mrf.mxu1  ;;  %v1344_v53 = vld [vmem:[%s3264_s5 + $0x70] sm:$0xff]  ;;  %v1375_v62 = vld [vmem:[%s3264_s5 + $0x168] sm:$0xff]  ;;  %1576 = vmatpush.msrb.mxu1 %v1390_v8  ;;  %v1373_v14 = vld [vmem:[%s3264_s5 + $0x158] sm:$0xff] }
 0x168   : > { %v1155_v21 = vrot.slane %v1154_v16, 4  ;;  %v934_v48 = vmax.f32 %v629_v17, 0.0  ;;  %v2513_v22 = vpop.f32.mrf.mxu0  ;;  %1514 = vmatpush.msra.mxu3 %v1344_v53  ;;  %1555 = vmatpush.msrb.mxu0 %v1375_v62 }
 0x169   : > { %v1194_v24 = vrot.slane %v1193_v19, 4  ;;  %v935_v23 = vmax.f32 %v658_v60, 0.0  ;;  %1577 = vmatpush.msrb.mxu1 %v1389_v15  ;;  %v1336_v60 = vld [vmem:[%s3264_s5 + $0x30] sm:$0xff] }
 0x16a   : > { %v1156_v26 = vadd.f32 %v1155_v21, %v1154_v16  ;;  %v1014_v27 = vmin.f32 %v934_v48, 6.0  ;;  %1515 = vmatpush.msra.mxu3 %v1343_v32  ;;  %1556 = vmatpush.msrb.mxu0 %v1374_v7  ;;  %v1372_v21 = vld [vmem:[%s3264_s5 + $0x150] sm:$0xff]  ;;  %v1386_v32 = vld [vmem:[%s3264_s5 + $0x1c0] sm:$0xff] }
 0x16b   : > { %v1195_v11 = vadd.f32 %v1194_v24, %v1193_v19  ;;  %v1015_v28 = vmin.f32 %v935_v23, 6.0  ;;  %v1388_v48 = vld [vmem:[%s3264_s5 + $0x1d0] sm:$0xff] }
 0x16c   : > { %v1167_v5 = vadd.f32 %v1166_v10, %v1014_v27  ;;  %v1157_v33 = vrot.slane %v1156_v26, 2  ;;  %1516 = vmatpush.msra.mxu3 %v1342_v40  ;;  %1557 = vmatpush.msrb.mxu0 %v1373_v14  ;;  %v1371_v27 = vld [vmem:[%s3264_s5 + $0x148] sm:$0xff]  ;;  %v1332_v40 = vld [vmem:[%s3264_s5 + $0x10] sm:$0xff] }
 0x16d   : > { %v1196_v29 = vrot.slane %v1195_v11, 2  ;;  %v1180_v30 = vadd.f32 %v1179_v13, %v1015_v28  ;;  %v2521_v31 = vpop.f32.mrf.mxu2  ;;  %v1337_v13 = vld [vmem:[%s3264_s5 + $0x38] sm:$0xff]  ;;  %1578 = vmatpush.msrb.mxu1 %v1388_v48  ;;  %v1358_v48 = vld [vmem:[%s3264_s5 + $0xe0] sm:$0xff] }
 0x16e   : > { %v1168_v34 = vrot.slane %v1167_v5, 4  ;;  %v2526_v35 = vpop.f32.mrf.mxu3  ;;  %v1158_v49 = vadd.f32 %v1157_v33, %v1156_v26  ;;  %1517 = vmatpush.msra.mxu3 %v1341_v44  ;;  %1558 = vmatpush.msrb.mxu0 %v1372_v21  ;;  %v1335_v26 = vld [vmem:[%s3264_s5 + $0x28] sm:$0xff]  ;;  %v2645_v44 = vperm.slane %v2449_v45, 4 }
 0x16f   : > { %v1197_v36 = vadd.f32 %v1196_v29, %v1195_v11  ;;  %v1181_v37 = vrot.slane %v1180_v30, 4  ;;  %v2528_v39 = vpop.f32.mrf.mxu1  ;;  %v1387_v11 = vld [vmem:[%s3264_s5 + $0x1c8] sm:$0xff]  ;;  %v1334_v29 = vld [vmem:[%s3264_s5 + $0x20] sm:$0xff] }
 0x170   : > { %v1169_v41 = vadd.f32 %v1168_v34, %v1167_v5  ;;  %v2533_v42 = vpop.f32.mrf.mxu0  ;;  %1518 = vmatpush.msra.mxu3 %v1340_v55  ;;  %v1159_v0 = vrot.slane %v1158_v49, 1  ;;  %1559 = vmatpush.msrb.mxu0 %v1371_v27  ;;  %v1333_v34 = vld [vmem:[%s3264_s5 + $0x18] sm:$0xff]  ;;  %v2664_v55 = vperm.slane %v2449_v45, 5  ;;  %v701_v62 = vadd.f32 %v2528_v39, %v2645_v44 }
 0x171   : > { %v1182_v43 = vadd.f32 %v1181_v37, %v1180_v30  ;;  %v1198_v52 = vrot.slane %v1197_v36, 1  ;;  %1579 = vmatpush.msrb.mxu1 %v1387_v11  ;;  %v1370_v30 = vld [vmem:[%s3264_s5 + $0x140] sm:$0xff]  ;;  %v1385_v37 = vld [vmem:[%s3264_s5 + $0x1b8] sm:$0xff] }
 0x172   : > { %v1170_v50 = vrot.slane %v1169_v41, 2  ;;  %1519 = vmatpush.msra.mxu3 %v1339_v51  ;;  %v1160_v16 = vadd.f32 %v1159_v0, %v1158_v49  ;;  %1560 = vmatpush.msrb.mxu0 %v1370_v30  ;;  %v1367_v49 = vld [vmem:[%s3264_s5 + $0x128] sm:$0xff]  ;;  %v1382_v51 = vld [vmem:[%s3264_s5 + $0x1a0] sm:$0xff]  ;;  %v1409_v0 = vld [vmem:[%s3264_s5 + $0x278] sm:$0xff]  ;;  %v728_v8 = vadd.f32 %v2521_v31, %v2664_v55 }
 0x173   : > { %v1183_v54 = vrot.slane %v1182_v43, 2  ;;  %v1199_v3 = vadd.f32 %v1198_v52, %v1197_v36  ;;  %1580 = vmatpush.msrb.mxu1 %v1386_v32  ;;  %v1369_v36 = vld [vmem:[%s3264_s5 + $0x138] sm:$0xff]  ;;  %v2659_v52 = vperm.slane %v2449_v45, 7  ;;  %1593 = vmatpush.msrb.mxu2 %v1409_v0  ;;  %v1378_v30 = vld [vmem:[%s3264_s5 + $0x180] sm:$0xff] }
 0x174   : > { %v1171_v58 = vadd.f32 %v1170_v50, %v1169_v41  ;;  %1520 = vmatpush.msra.mxu3 %v1338_v6  ;;  %1561 = vmatpush.msrb.mxu0 %v1369_v36  ;;  %v1368_v41 = vld [vmem:[%s3264_s5 + $0x130] sm:$0xff]  ;;  %v1383_v50 = vld [vmem:[%s3264_s5 + $0x1a8] sm:$0xff]  ;;  %v1365_v39 = vld [vmem:[%s3264_s5 + $0x118] sm:$0xff] }
 0x175   : > { %v1184_v59 = vadd.f32 %v1183_v54, %v1182_v43  ;;  %v2553_v61 = vpop.f32.mrf.mxu2  ;;  %v1290_v18 = vrot.slane %v1199_v3, 5  ;;  %1581 = vmatpush.msrb.mxu1 %v1385_v37  ;;  %v1384_v43 = vld [vmem:[%s3264_s5 + $0x1b0] sm:$0xff]  ;;  %v788_v3 = vadd.f32 %v2533_v42, %v2659_v52  ;;  %v786_v6 = vadd.f32 %v2513_v22, %v2659_v52 }
 0x176   : > { %v1172_v1 = vrot.slane %v1171_v58, 1  ;;  %v2564_v2 = vpop.f32.mrf.mxu3  ;;  %1521 = vmatpush.msra.mxu3 %v1337_v13  ;;  %1562 = vmatpush.msrb.mxu0 %v1368_v41  ;;  %v730_v7 = vadd.f32 %v2553_v61, %v2664_v55  ;;  %v1408_v42 = vld [vmem:[%s3264_s5 + $0x270] sm:$0xff]  ;;  %v877_v13 = vmax.f32 %v701_v62, 0.0  ;;  %v1441_v41 = vld [vmem:[%s3264_s5 + $0x378] sm:$0xff] }
 0x177   : > { %v1185_v38 = vrot.slane %v1184_v59, 1  ;;  %v2566_v4 = vpop.f32.mrf.mxu1  ;;  %1582 = vmatpush.msrb.mxu1 %v1384_v43  ;;  %v759_v22 = vadd.f32 %v2564_v2, %v2667_v56  ;;  %v1364_v61 = vld [vmem:[%s3264_s5 + $0x110] sm:$0xff]  ;;  %1594 = vmatpush.msrb.mxu2 %v1408_v42  ;;  %v1407_v2 = vld [vmem:[%s3264_s5 + $0x268] sm:$0xff]  ;;  %v880_v15 = vmax.f32 %v788_v3, 0.0 }
 0x178   : > { %v1173_v9 = vadd.f32 %v1172_v1, %v1171_v58  ;;  %v2577_v10 = vpop.f32.mrf.mxu0  ;;  %1522 = vmatpush.msra.mxu3 %v1336_v60  ;;  %1563 = vmatpush.msrb.mxu0 %v1367_v49  ;;  %v1330_v58 = vld [vmem:[%s3264_s5] sm:$0xff]  ;;  %v699_v1 = vadd.f32 %v2511_v20, %v2645_v44  ;;  %v1360_v20 = vld [vmem:[%s3264_s5 + $0xf0] sm:$0xff]  ;;  %v704_v31 = vadd.f32 %v2566_v4, %v2645_v44  ;;  %v1363_v4 = vld [vmem:[%s3264_s5 + $0x108] sm:$0xff]  ;;  %v878_v60 = vmax.f32 %v730_v7, 0.0 }
 0x179   : > { %v1186_v12 = vadd.f32 %v1185_v38, %v1184_v59  ;;  %1583 = vmatpush.msrb.mxu1 %v1383_v50  ;;  %v1366_v59 = vld [vmem:[%s3264_s5 + $0x120] sm:$0xff]  ;;  %v1381_v38 = vld [vmem:[%s3264_s5 + $0x198] sm:$0xff]  ;;  %1595 = vmatpush.msrb.mxu2 %v1407_v2  ;;  %v879_v27 = vmax.f32 %v759_v22, 0.0  ;;  %v957_v32 = vmin.f32 %v877_v13, 6.0  ;;  %v1356_v62 = vld [vmem:[%s3264_s5 + $0xd0] sm:$0xff] }
 0x17a   : > { %v1288_v17 = vrot.slane %v1173_v9, 7  ;;  %1523 = vmatpush.msra.mxu3 %v1335_v26  ;;  %1564 = vmatpush.msrb.mxu0 %v1366_v59  ;;  %v757_v9 = vadd.f32 %v2526_v35, %v2667_v56  ;;  %v1359_v35 = vld [vmem:[%s3264_s5 + $0xe8] sm:$0xff]  ;;  %v867_v14 = vmax.f32 %v699_v1, 0.0  ;;  %v1457_v50 = vld [vmem:[%s3264_s5 + $0x3f8] sm:$0xff]  ;;  %v958_v59 = vmin.f32 %v878_v60, 6.0 }
 0x17b   : > { %v1289_v19 = vrot.slane %v1186_v12, 6  ;;  %1584 = vmatpush.msrb.mxu1 %v1382_v51  ;;  %v1380_v12 = vld [vmem:[%s3264_s5 + $0x190] sm:$0xff]  ;;  %v959_v3 = vmin.f32 %v879_v27, 6.0  ;;  %v1439_v22 = vld [vmem:[%s3264_s5 + $0x368] sm:$0xff] }
 0x17c   : > { %v1297_v24 = vsel %vm1296_vm1, %v1160_v16, %v1288_v17  ;;  %1524 = vmatpush.msra.mxu3 %v1334_v29  ;;  %1565 = vmatpush.msrb.mxu0 %v1365_v39  ;;  %v2732_v16 = vadd.f32 %v2577_v10, %v2659_v52  ;;  %v869_v26 = vmax.f32 %v757_v9, 0.0  ;;  %v1362_v29 = vld [vmem:[%s3264_s5 + $0x100] sm:$0xff]  ;;  %v947_v43 = vmin.f32 %v867_v14, 6.0  ;;  %v1403_v9 = vld [vmem:[%s3264_s5 + $0x248] sm:$0xff] }
 0x17d   : > { %v1299_v23 = vsel %vm1298_vm2, %v1289_v19, %v1290_v18  ;;  %v2598_v25 = vpop.f32.mrf.mxu2  ;;  %1585 = vmatpush.msrb.mxu1 %v1381_v38  ;;  %v1379_v18 = vld [vmem:[%s3264_s5 + $0x188] sm:$0xff]  ;;  %v870_v19 = vmax.f32 %v786_v6, 0.0  ;;  %v1456_v38 = vld [vmem:[%s3264_s5 + $0x3f0] sm:$0xff] }
 0x17e   : > { %v2609_v28 = vsel %vm1300_vm3, %v1297_v24, %v1299_v23  ;;  %v2611_v53 = vpop.f32.mrf.mxu3  ;;  %1525 = vmatpush.msra.mxu3 %v1333_v34  ;;  %1566 = vmatpush.msrb.mxu0 %v1364_v61  ;;  %v2744_v21 = vadd.f32 %v2598_v25, %v2664_v55  ;;  %v1406_v24 = vld [vmem:[%s3264_s5 + $0x260] sm:$0xff]  ;;  %v868_v23 = vmax.f32 %v728_v8, 0.0  ;;  %v887_v34 = vmax.f32 %v704_v31, 0.0  ;;  %v1355_v8 = vld [vmem:[%s3264_s5 + $0xc8] sm:$0xff] }
 0x17f   : > { %v2613_v5 = vpop.f32.mrf.mxu1  ;;  %1586 = vmatpush.msrb.mxu1 %v1380_v12  ;;  %v2756_v11 = vadd.f32 %v2611_v53, %v2667_v56  ;;  %1596 = vmatpush.msrb.mxu2 %v1406_v24  ;;  %v1357_v53 = vld [vmem:[%s3264_s5 + $0xd8] sm:$0xff]  ;;  %v949_v1 = vmin.f32 %v869_v26, 6.0  ;;  %v1200_v6 = vadd.f32 %v957_v32, %v947_v43 }
 0x180   : > { %v2624_v33 = vpop.f32.mrf.mxu0  ;;  %1526 = vmatpush.msra.mxu3 %v1332_v40  ;;  %1567 = vmatpush.msrb.mxu0 %v1363_v4  ;;  %v2766_v36 = vadd.f32 %v2613_v5, %v2645_v44  ;;  %v1405_v40 = vld [vmem:[%s3264_s5 + $0x258] sm:$0xff]  ;;  %v890_v5 = vmax.f32 %v2732_v16, 0.0  ;;  %v888_v51 = vmax.f32 %v2744_v21, 0.0  ;;  %v948_v0 = vmin.f32 %v868_v23, 6.0  ;;  %v1454_v23 = vld [vmem:[%s3264_s5 + $0x3e0] sm:$0xff] }
 0x181   : > { %1587 = vmatpush.msrb.mxu1 %v1379_v18  ;;  %v2780_v49 = vadd.f32 %v2624_v33, %v2659_v52  ;;  %1597 = vmatpush.msrb.mxu2 %v1405_v40  ;;  %v1404_v33 = vld [vmem:[%s3264_s5 + $0x250] sm:$0xff]  ;;  %v889_v39 = vmax.f32 %v2756_v11, 0.0  ;;  %v967_v7 = vmin.f32 %v887_v34, 6.0  ;;  %v1402_v18 = vld [vmem:[%s3264_s5 + $0x240] sm:$0xff]  ;;  %v1437_v32 = vld [vmem:[%s3264_s5 + $0x358] sm:$0xff] }
 0x182   : > { %1527 = vmatpush.msra.mxu3 %v1331_v47  ;;  %1568 = vmatpush.msrb.mxu0 %v1362_v29  ;;  %v960_v47 = vmin.f32 %v880_v15, 6.0  ;;  %v970_v12 = vmin.f32 %v890_v5, 6.0  ;;  %v1213_v2 = vadd.f32 %v958_v59, %v948_v0  ;;  %v968_v14 = vmin.f32 %v888_v51, 6.0  ;;  %v1453_v40 = vld [vmem:[%s3264_s5 + $0x3d8] sm:$0xff] }
 0x183   : > { %1588 = vmatpush.msrb.mxu1 %v1378_v30  ;;  %1598 = vmatpush.msrb.mxu2 %v1404_v33  ;;  %v900_v13 = vmax.f32 %v2780_v49, 0.0  ;;  %v969_v60 = vmin.f32 %v889_v39, 6.0  ;;  %v1201_v26 = vadd.f32 %v1200_v6, %v967_v7  ;;  %v1401_v30 = vld [vmem:[%s3264_s5 + $0x238] sm:$0xff]  ;;  %v1352_v49 = vld [vmem:[%s3264_s5 + $0xb0] sm:$0xff]  ;;  %v1399_v39 = vld [vmem:[%s3264_s5 + $0x228] sm:$0xff] }
 0x184   : > { %1528 = vmatpush.msra.mxu3 %v1330_v58  ;;  %v950_v58 = vmin.f32 %v870_v19, 6.0  ;;  %1633 = vmatpush.msra.mxu0 %v1441_v41  ;;  %v1438_v19 = vld [vmem:[%s3264_s5 + $0x360] sm:$0xff]  ;;  %v2867_v41 = vadd.f32 %v1213_v2, %v968_v14  ;;  %v1452_v33 = vld [vmem:[%s3264_s5 + $0x3d0] sm:$0xff] }
 0x185   : > { %v2647_v46 = vpop.f32.mrf.mxu2  ;;  %1653 = vmatpush.msra.mxu1 %v1457_v50  ;;  %1599 = vmatpush.msrb.mxu2 %v1403_v9  ;;  %v1400_v50 = vld [vmem:[%s3264_s5 + $0x230] sm:$0xff]  ;;  %v1451_v9 = vld [vmem:[%s3264_s5 + $0x3c8] sm:$0xff]  ;;  %v1434_v2 = vld [vmem:[%s3264_s5 + $0x340] sm:$0xff] }
 0x186   : > { %v2661_v54 = vpop.f32.mrf.mxu3  ;;  %1533 = vmatpush.msrb.mxu3 %v1361_v63  ;;  %v1440_v63 = vld [vmem:[%s3264_s5 + $0x370] sm:$0xff]  ;;  %v1239_v61 = vadd.f32 %v960_v47, %v950_v58  ;;  %v2823_v15 = vadd.f32 %v2647_v46, %v2664_v55  ;;  %v1226_v46 = vadd.f32 %v959_v3, %v949_v1 }
 0x187   : > { %v2669_v57 = vpop.f32.mrf.mxu1  ;;  %1634 = vmatpush.msra.mxu0 %v1440_v63  ;;  %1654 = vmatpush.msra.mxu1 %v1456_v38  ;;  %v2839_v21 = vadd.f32 %v2661_v54, %v2667_v56  ;;  %v1353_v54 = vld [vmem:[%s3264_s5 + $0xb8] sm:$0xff]  ;;  %v1436_v58 = vld [vmem:[%s3264_s5 + $0x350] sm:$0xff]  ;;  %v1435_v38 = vld [vmem:[%s3264_s5 + $0x348] sm:$0xff] }
 0x188   : > { %v2682_v45 = vpop.f32.mrf.mxu0  ;;  %1534 = vmatpush.msrb.mxu3 %v1360_v20  ;;  %v897_v20 = vmax.f32 %v2766_v36, 0.0  ;;  %v2802_v42 = vadd.f32 %v2669_v57, %v2645_v44  ;;  %1600 = vmatpush.msrb.mxu2 %v1402_v18  ;;  %v1240_v34 = vadd.f32 %v1239_v61, %v970_v12  ;;  %v980_v36 = vmin.f32 %v900_v13, 6.0  ;;  %v1450_v18 = vld [vmem:[%s3264_s5 + $0x3c0] sm:$0xff] }
 0x189   : > { %v2816_v57 = vadd.f32 %v2682_v45, %v2659_v52  ;;  %1635 = vmatpush.msra.mxu0 %v1439_v22  ;;  %v1354_v45 = vld [vmem:[%s3264_s5 + $0xc0] sm:$0xff]  ;;  %v898_v43 = vmax.f32 %v2823_v15, 0.0  ;;  %v2884_v59 = vadd.f32 %v1226_v46, %v969_v60 }
 0x18a   : > { %1535 = vmatpush.msrb.mxu3 %v1359_v35  ;;  %v1455_v35 = vld [vmem:[%s3264_s5 + $0x3e8] sm:$0xff]  ;;  %v977_v27 = vmin.f32 %v897_v20, 6.0  ;;  %v907_v11 = vmax.f32 %v2802_v42, 0.0  ;;  %1601 = vmatpush.msrb.mxu2 %v1401_v30  ;;  %v1241_v6 = vadd.f32 %v1240_v34, %v980_v36  ;;  %v1348_v36 = vld [vmem:[%s3264_s5 + $0x90] sm:$0xff] }
 0x18b   : > { %1655 = vmatpush.msra.mxu1 %v1455_v35  ;;  %1636 = vmatpush.msra.mxu0 %v1438_v19  ;;  %v978_v22 = vmin.f32 %v898_v43, 6.0  ;;  %v1398_v35 = vld [vmem:[%s3264_s5 + $0x220] sm:$0xff] }
 0x18c   : > { %1536 = vmatpush.msrb.mxu3 %v1358_v48  ;;  %v1202_v63 = vadd.f32 %v1201_v26, %v977_v27  ;;  %v987_v0 = vmin.f32 %v907_v11, 6.0  ;;  %1602 = vmatpush.msrb.mxu2 %v1400_v50  ;;  %v1433_v26 = vld [vmem:[%s3264_s5 + $0x338] sm:$0xff] }
 0x18d   : > { %v2734_v17 = vpop.f32.mrf.mxu2  ;;  %1656 = vmatpush.msra.mxu1 %v1454_v23  ;;  %1637 = vmatpush.msra.mxu0 %v1437_v32  ;;  %v1397_v23 = vld [vmem:[%s3264_s5 + $0x218] sm:$0xff] }
 0x18e   : > { %v2746_v10 = vpop.f32.mrf.mxu3  ;;  %1537 = vmatpush.msrb.mxu3 %v1357_v53  ;;  %v2872_v47 = vadd.f32 %v2734_v17, %v2664_v55  ;;  %v899_v17 = vmax.f32 %v2839_v21, 0.0  ;;  %1603 = vmatpush.msrb.mxu2 %v1399_v39  ;;  %v1203_v19 = vadd.f32 %v1202_v63, %v987_v0 }
 0x18f   : > { %v710_v25 = vpop.f32.mrf.mxu1  ;;  %v2889_v51 = vadd.f32 %v2746_v10, %v2667_v56  ;;  %1657 = vmatpush.msra.mxu1 %v1453_v40  ;;  %1638 = vmatpush.msra.mxu0 %v1436_v58  ;;  %v1351_v10 = vld [vmem:[%s3264_s5 + $0xa8] sm:$0xff] }
 0x190   : > { %v797_v37 = vpop.f32.mrf.mxu0  ;;  %1538 = vmatpush.msrb.mxu3 %v1356_v62  ;;  %v2826_v16 = vadd.f32 %v710_v25, %v2645_v44  ;;  %v908_v61 = vmax.f32 %v2872_v47, 0.0  ;;  %v979_v14 = vmin.f32 %v899_v17, 6.0  ;;  %1604 = vmatpush.msrb.mxu2 %v1398_v35 }
 0x191   : > { %v2842_v48 = vadd.f32 %v797_v37, %v2659_v52  ;;  %v910_v37 = vmax.f32 %v2816_v57, 0.0  ;;  %1658 = vmatpush.msra.mxu1 %v1452_v33  ;;  %1639 = vmatpush.msra.mxu0 %v1435_v38  ;;  %v909_v15 = vmax.f32 %v2889_v51, 0.0  ;;  %v1347_v51 = vld [vmem:[%s3264_s5 + $0x88] sm:$0xff] }
 0x192   : > { %1539 = vmatpush.msrb.mxu3 %v1355_v8  ;;  %v917_v5 = vmax.f32 %v2826_v16, 0.0  ;;  %1605 = vmatpush.msrb.mxu2 %v1397_v23  ;;  %v1431_v33 = vld [vmem:[%s3264_s5 + $0x328] sm:$0xff]  ;;  %v1228_v63 = vadd.f32 %v2884_v59, %v979_v14  ;;  %v1346_v59 = vld [vmem:[%s3264_s5 + $0x80] sm:$0xff]  ;;  %v1444_v23 = vld [vmem:[%s3264_s5 + $0x390] sm:$0xff] }
 0x193   : > { %v920_v62 = vmax.f32 %v2842_v48, 0.0  ;;  %v990_v7 = vmin.f32 %v910_v37, 6.0  ;;  %1659 = vmatpush.msra.mxu1 %v1451_v9  ;;  %1640 = vmatpush.msra.mxu0 %v1434_v2  ;;  %v1432_v37 = vld [vmem:[%s3264_s5 + $0x330] sm:$0xff] }
 0x194   : > { %1540 = vmatpush.msrb.mxu3 %v1354_v45  ;;  %v997_v12 = vmin.f32 %v917_v5, 6.0  ;;  %v1448_v5 = vld [vmem:[%s3264_s5 + $0x3b0] sm:$0xff] }
 0x195   : > { %v739_v31 = vpop.f32.mrf.mxu2  ;;  %v1000_v16 = vmin.f32 %v920_v62, 6.0  ;;  %v1242_v27 = vadd.f32 %v1241_v6, %v990_v7  ;;  %1660 = vmatpush.msra.mxu1 %v1450_v18  ;;  %1641 = vmatpush.msra.mxu0 %v1433_v26  ;;  %v1395_v62 = vld [vmem:[%s3264_s5 + $0x208] sm:$0xff]  ;;  %v1445_v18 = vld [vmem:[%s3264_s5 + $0x398] sm:$0xff] }
 0x196   : > { %v768_v4 = vpop.f32.mrf.mxu3  ;;  %1541 = vmatpush.msrb.mxu3 %v1353_v54  ;;  %v2896_v1 = vadd.f32 %v739_v31, %v2664_v55  ;;  %v1350_v31 = vld [vmem:[%s3264_s5 + $0xa0] sm:$0xff]  ;;  %v988_v54 = vmin.f32 %v908_v61, 6.0  ;;  %v1204_v30 = vadd.f32 %v1203_v19, %v997_v12 }
 0x197   : > { %v713_v24 = vpop.f32.mrf.mxu1  ;;  %v2909_v20 = vadd.f32 %v768_v4, %v2667_v56  ;;  %v1243_v40 = vadd.f32 %v1242_v27, %v1000_v16  ;;  %1642 = vmatpush.msra.mxu0 %v1432_v37  ;;  %v1442_v37 = vld [vmem:[%s3264_s5 + $0x380] sm:$0xff] }
 0x198   : > { %v2849_v25 = vadd.f32 %v713_v24, %v2645_v44  ;;  %v800_v29 = vpop.f32.mrf.mxu0  ;;  %1542 = vmatpush.msrb.mxu3 %v1352_v49  ;;  %v918_v46 = vmax.f32 %v2896_v1, 0.0  ;;  %v1349_v24 = vld [vmem:[%s3264_s5 + $0x98] sm:$0xff]  ;;  %v1215_v49 = vadd.f32 %v2867_v41, %v978_v22 }
 0x199   : > { %v2862_v53 = vadd.f32 %v800_v29, %v2659_v52  ;;  %v919_v11 = vmax.f32 %v2909_v20, 0.0  ;;  %v1449_v29 = vld [vmem:[%s3264_s5 + $0x3b8] sm:$0xff]  ;;  %1643 = vmatpush.msra.mxu0 %v1431_v33 }
 0x19a   : > { %v927_v3 = vmax.f32 %v2849_v25, 0.0  ;;  %1543 = vmatpush.msrb.mxu3 %v1351_v10  ;;  %1661 = vmatpush.msra.mxu1 %v1449_v29  ;;  %v998_v50 = vmin.f32 %v918_v46, 6.0  ;;  %v1447_v10 = vld [vmem:[%s3264_s5 + $0x3a8] sm:$0xff]  ;;  %v1216_v39 = vadd.f32 %v1215_v49, %v988_v54 }
 0x19b   : > { %v930_v42 = vmax.f32 %v2862_v53, 0.0  ;;  %v989_v53 = vmin.f32 %v909_v15, 6.0  ;;  %v999_v41 = vmin.f32 %v919_v11, 6.0  ;;  %v1427_v29 = vld [vmem:[%s3264_s5 + $0x308] sm:$0xff] }
 0x19c   : > { %1544 = vmatpush.msrb.mxu3 %v1350_v31  ;;  %v1007_v60 = vmin.f32 %v927_v3, 6.0  ;;  %1662 = vmatpush.msra.mxu1 %v1448_v5  ;;  %v1443_v54 = vld [vmem:[%s3264_s5 + $0x388] sm:$0xff] }
 0x19d   : > { %v742_v8 = vpop.f32.mrf.mxu2  ;;  %v1010_v25 = vmin.f32 %v930_v42, 6.0  ;;  %v1394_v42 = vld [vmem:[%s3264_s5 + $0x200] sm:$0xff]  ;;  %v1229_v9 = vadd.f32 %v1228_v63, %v989_v53 }
 0x19e   : > { %v2917_v13 = vadd.f32 %v742_v8, %v2664_v55  ;;  %v771_v57 = vpop.f32.mrf.mxu3  ;;  %1545 = vmatpush.msrb.mxu3 %v1349_v24  ;;  %v1205_v58 = vadd.f32 %v1204_v30, %v1007_v60  ;;  %v1430_v8 = vld [vmem:[%s3264_s5 + $0x320] sm:$0xff]  ;;  %1663 = vmatpush.msra.mxu1 %v1447_v10  ;;  %v1428_v24 = vld [vmem:[%s3264_s5 + $0x310] sm:$0xff] }
 0x19f   : > { %v2930_v4 = vadd.f32 %v771_v57, %v2667_v56  ;;  %v715_v45 = vpop.f32.mrf.mxu1  ;;  %v1244_v0 = vadd.f32 %v1243_v40, %v1010_v25  ;;  %v1217_v57 = vadd.f32 %v1216_v39, %v998_v50  ;;  %1644 = vmatpush.msra.mxu0 %v1430_v8  ;;  %v1230_v2 = vadd.f32 %v1229_v9, %v999_v41 }
 0x1a0   : > { %v716_v21 = vadd.f32 %v715_v45, %v2645_v44  ;;  %v802_v48 = vpop.f32.mrf.mxu0  ;;  %v928_v32 = vmax.f32 %v2917_v13, 0.0  ;;  %1546 = vmatpush.msrb.mxu3 %v1348_v36  ;;  %v1446_v13 = vld [vmem:[%s3264_s5 + $0x3a0] sm:$0xff]  ;;  %v1429_v45 = vld [vmem:[%s3264_s5 + $0x318] sm:$0xff] }
 0x1a1   : > { %v803_v44 = vadd.f32 %v802_v48, %v2659_v52  ;;  %v1396_v52 = vld [vmem:[%s3264_s5 + $0x210] sm:$0xff]  ;;  %v929_v43 = vmax.f32 %v2930_v4, 0.0  ;;  %1664 = vmatpush.msra.mxu1 %v1446_v13  ;;  %1645 = vmatpush.msra.mxu0 %v1429_v45 }
 0x1a2   : > { %v937_v34 = vmax.f32 %v716_v21, 0.0  ;;  %1606 = vmatpush.msrb.mxu2 %v1396_v52  ;;  %1547 = vmatpush.msrb.mxu3 %v1347_v51  ;;  %v1008_v38 = vmin.f32 %v928_v32, 6.0  ;;  %v1426_v52 = vld [vmem:[%s3264_s5 + $0x300] sm:$0xff] }
 0x1a3   : > { %v940_v47 = vmax.f32 %v803_v44, 0.0  ;;  %v1009_v22 = vmin.f32 %v929_v43, 6.0  ;;  %1665 = vmatpush.msra.mxu1 %v1445_v18  ;;  %1646 = vmatpush.msra.mxu0 %v1428_v24  ;;  %v1473_v24 = vld [vmem:[%s3264_s5 + $0x478] sm:$0xff] }
 0x1a4   : > { %v1017_v17 = vmin.f32 %v937_v34, 6.0  ;;  %1607 = vmatpush.msrb.mxu2 %v1395_v62  ;;  %1548 = vmatpush.msrb.mxu3 %v1346_v59  ;;  %v1218_v16 = vadd.f32 %v1217_v57, %v1008_v38 }
 0x1a5   : > { %v1020_v1 = vmin.f32 %v940_v47, 6.0  ;;  %v744_v3 = vpop.f32.mrf.mxu2  ;;  %v1231_v19 = vadd.f32 %v1230_v2, %v1009_v22  ;;  %1666 = vmatpush.msra.mxu1 %v1444_v23  ;;  %1647 = vmatpush.msra.mxu0 %v1427_v29  ;;  %v1424_v2 = vld [vmem:[%s3264_s5 + $0x2f0] sm:$0xff] }
 0x1a6   : > { %v1206_v6 = vadd.f32 %v1205_v58, %v1017_v17  ;;  %v745_v7 = vadd.f32 %v744_v3, %v2664_v55  ;;  %v773_v20 = vpop.f32.mrf.mxu3  ;;  %1608 = vmatpush.msrb.mxu2 %v1394_v42 }
 0x1a7   : > { %v1245_v61 = vadd.f32 %v1244_v0, %v1020_v1  ;;  %v774_v55 = vadd.f32 %v773_v20, %v2667_v56  ;;  %v2990_v12 = vpop.f32.mrf.mxu1  ;;  %1667 = vmatpush.msra.mxu1 %v1443_v54  ;;  %1648 = vmatpush.msra.mxu0 %v1426_v52  ;;  %v1419_v54 = vld [vmem:[%s3264_s5 + $0x2c8] sm:$0xff] }
 0x1a8   : > { %v1207_v31 = vrot.slane %v1206_v6, 4  ;;  %v938_v35 = vmax.f32 %v745_v7, 0.0  ;;  %1673 = vmatpush.msra.mxu2 %v1473_v24  ;;  %v1471_v52 = vld [vmem:[%s3264_s5 + $0x468] sm:$0xff] }
 0x1a9   : > { %v1246_v14 = vrot.slane %v1245_v61, 4  ;;  %v939_v15 = vmax.f32 %v774_v55, 0.0  ;;  %1668 = vmatpush.msra.mxu1 %v1442_v37 }
 0x1aa   : > { %v1208_v4 = vadd.f32 %v1207_v31, %v1206_v6  ;;  %v1018_v56 = vmin.f32 %v938_v35, 6.0  ;;  %v1425_v35 = vld [vmem:[%s3264_s5 + $0x2f8] sm:$0xff] }
 0x1ab   : > { %v1247_v46 = vadd.f32 %v1246_v14, %v1245_v61  ;;  %v1019_v60 = vmin.f32 %v939_v15, 6.0  ;;  %v1423_v14 = vld [vmem:[%s3264_s5 + $0x2e8] sm:$0xff] }
 0x1ac   : > { %v1209_v21 = vrot.slane %v1208_v4, 2  ;;  %v1219_v48 = vadd.f32 %v1218_v16, %v1018_v56 }
 0x1ad   : > { %v1248_v26 = vrot.slane %v1247_v46, 2  ;;  %v1232_v27 = vadd.f32 %v1231_v19, %v1019_v60  ;;  %v3007_v11 = vpop.f32.mrf.mxu2 }
 0x1ae   : > { %v1210_v25 = vadd.f32 %v1209_v21, %v1208_v4  ;;  %v1220_v44 = vrot.slane %v1219_v48, 4  ;;  %v1422_v4 = vld [vmem:[%s3264_s5 + $0x2e0] sm:$0xff] }
 0x1af   : > { %v1249_v30 = vadd.f32 %v1248_v26, %v1247_v46  ;;  %v1233_v32 = vrot.slane %v1232_v27, 4  ;;  %v816_v34 = vpop.f32.mrf.mxu1  ;;  %v1421_v46 = vld [vmem:[%s3264_s5 + $0x2d8] sm:$0xff]  ;;  %v1420_v26 = vld [vmem:[%s3264_s5 + $0x2d0] sm:$0xff] }
 0x1b0   : > { %v1221_v36 = vadd.f32 %v1220_v44, %v1219_v48  ;;  %v1211_v40 = vrot.slane %v1210_v25, 1  ;;  %v1472_v44 = vld [vmem:[%s3264_s5 + $0x470] sm:$0xff] }
 0x1b1   : > { %v1234_v53 = vadd.f32 %v1233_v32, %v1232_v27  ;;  %v1250_v47 = vrot.slane %v1249_v30, 1  ;;  %1674 = vmatpush.msra.mxu2 %v1472_v44  ;;  %v1412_v44 = vld [vmem:[%s3264_s5 + $0x290] sm:$0xff] }
 0x1b2   : > { %v1222_v43 = vrot.slane %v1221_v36, 2  ;;  %v1212_v17 = vadd.f32 %v1211_v40, %v1210_v25 }
 0x1b3   : > { %v1235_v5 = vrot.slane %v1234_v53, 2  ;;  %v1251_v62 = vadd.f32 %v1250_v47, %v1249_v30  ;;  %v2120_v47 = vmov 0.0   ;;  %1675 = vmatpush.msra.mxu2 %v1471_v52  ;;  %v1463_v52 = vld [vmem:[%s3264_s5 + $0x428] sm:$0xff] }
 0x1b4   : > { %v1223_v49 = vadd.f32 %v1222_v43, %v1221_v36  ;;  %v1291_v1 = vrot.slane %v1212_v17, 4  ;;  %v1418_v43 = vld [vmem:[%s3264_s5 + $0x2c0] sm:$0xff] }
 0x1b5   : > { %v1236_v50 = vadd.f32 %v1235_v5, %v1234_v53  ;;  %v3021_v58 = vpop.f32.mrf.mxu2  ;;  %v1294_v10 = vrot.slane %v1251_v62, 1  ;;  %v1417_v62 = vld [vmem:[%s3264_s5 + $0x2b8] sm:$0xff]  ;;  %v1474_v36 = vld [vmem:[%s3264_s5 + $0x480] sm:$0xff] }
 0x1b6   : > { %v1224_v51 = vrot.slane %v1223_v49, 1 }
 0x1b7   : > { %v1237_v33 = vrot.slane %v1236_v50, 1  ;;  %v819_v63 = vpop.f32.mrf.mxu1 }
 0x1b8   : > { %v1225_v41 = vadd.f32 %v1224_v51, %v1223_v49 }
 0x1b9   : > { %v1238_v0 = vadd.f32 %v1237_v33, %v1236_v50 }
 0x1ba   : > { %v1292_v3 = vrot.slane %v1225_v41, 3 }
 0x1bb   : > { %v1293_v39 = vrot.slane %v1238_v0, 2 }
 0x1bc   : > { %v1303_v38 = vsel %vm1302_vm4, %v1291_v1, %v1292_v3  ;;  %v1469_v1 = vld [vmem:[%s3264_s5 + $0x458] sm:$0xff] }
 0x1bd   : > { %v1305_v6 = vsel %vm1304_vm5, %v1293_v39, %v1294_v10  ;;  %v848_v7 = vpop.f32.mrf.mxu2  ;;  %v1416_v39 = vld [vmem:[%s3264_s5 + $0x2b0] sm:$0xff] }
 0x1be   : > { %v1307_v20 = vsel %vm1306_vm6, %v1303_v38, %v1305_v6 }
 0x1bf   : > { %v1309_v59 = vsel %vm1308_vm7, %v2609_v28, %v1307_v20  ;;  %v821_v42 = vpop.f32.mrf.mxu1  ;;  %v438_v28 = vld [vmem:[%s3263_s4 + $0x8] sm:$0x3] }
 0x1c0   : > { %v1326_v8 = vmul.f32 0.015625, %v1309_v59  ;;  %v3044_v15 = vperm.slane %v438_v28, 0  ;;  %v3062_v23 = vperm.slane %v438_v28, 1  ;;  %v1468_v59 = vld [vmem:[%s3264_s5 + $0x450] sm:$0xff] }
 0x1c2   : > { %v3024_v9 = vmax.f32 %v1326_v8, 0.0  ;;  %v817_v56 = vadd.f32 %v816_v34, %v3044_v15  ;;  %v815_v21 = vadd.f32 %v2990_v12, %v3044_v15  ;;  %v820_v48 = vadd.f32 %v819_v63, %v3044_v15 }
 0x1c3   : > { %v822_v25 = vadd.f32 %v821_v42, %v3044_v15  ;;  %v310_v12 = vlaneseq  ;;  %v846_v29 = vadd.f32 %v3021_v58, %v3062_v23  ;;  %v844_v37 = vadd.f32 %v3007_v11, %v3062_v23  ;;  %v1470_v11 = vld [vmem:[%s3264_s5 + $0x460] sm:$0xff] }
 0x1c4   : > { %v1493_v61 = vperm.slane %v3024_v9, 0  ;;  %v1495_v55 = vperm.slane %v3024_v9, 2  ;;  %v1496_v57 = vperm.slane %v3024_v9, 3  ;;  %v1497_v31 = vperm.slane %v3024_v9, 4  ;;  %1676 = vmatpush.msra.mxu2 %v1470_v11 }
 0x1c5   : > { %v3026_v22 = vpop.f32.mrf.mxu2  ;;  %v1499_v45 = vperm.slane %v3024_v9, 6  ;;  %v1494_v19 = vperm.slane %v3024_v9, 1  ;;  %v1500_v60 = vperm.slane %v3024_v9, 7  ;;  %v881_v27 = vmax.f32 %v817_v56, 0.0 }
 0x1c6   : > { %1529 = vmatmul.f32.vlgmr.msra.gmra.mxu3 %v1493_v61  ;;  %1569 = vmatmul.f32.vlgmr.msrb.gmra.mxu0 %v1495_v55  ;;  %v871_v30 = vmax.f32 %v815_v21, 0.0  ;;  %v891_v32 = vmax.f32 %v820_v48, 0.0  ;;  %vm3077_vm8 = vcmp.lt.s32.totalorder %v310_v12, 256  ;;  %v849_v53 = vadd.f32 %v848_v7, %v3062_v23  ;;  %v1413_v21 = vld [vmem:[%s3264_s5 + $0x298] sm:$0xff] }
 0x1c7   : > { %v824_v13 = vpop.f32.mrf.mxu1  ;;  %1589 = vmatmul.f32.vlgmr.msrb.gmra.mxu1 %v1496_v57  ;;  %1609 = vmatmul.f32.vlgmr.msrb.gmra.mxu2 %v1497_v31  ;;  %314 = vst.msk [vmem:[#allocation2 + $0x8] sm:$0x3] %vm3077_vm8, %v2120_v47  ;;  %v961_v5 = vmin.f32 %v881_v27, 6.0  ;;  %v901_v49 = vmax.f32 %v822_v25, 0.0  ;;  %v882_v58 = vmax.f32 %v846_v29, 0.0  ;;  %v851_v17 = vadd.f32 %v3026_v22, %v3062_v23  ;;  %v1415_v22 = vld [vmem:[%s3264_s5 + $0x2a8] sm:$0xff] }
 0x1c8   : > { %1613 = vmatpush.msra.mxu3 %v1425_v35  ;;  %v825_v34 = vadd.f32 %v824_v13, %v3044_v15  ;;  %v951_v33 = vmin.f32 %v871_v30, 6.0  ;;  %v971_v63 = vmin.f32 %v891_v32, 6.0  ;;  %v872_v3 = vmax.f32 %v844_v37, 0.0  ;;  %1677 = vmatpush.msra.mxu2 %v1469_v1  ;;  %v1467_v31 = vld [vmem:[%s3264_s5 + $0x448] sm:$0xff]  ;;  %v1465_v48 = vld [vmem:[%s3264_s5 + $0x438] sm:$0xff]  ;;  %v1464_v29 = vld [vmem:[%s3264_s5 + $0x430] sm:$0xff] }
 0x1c9   : > { %v892_v10 = vmax.f32 %v849_v53, 0.0  ;;  %v981_v6 = vmin.f32 %v901_v49, 6.0  ;;  %v962_v42 = vmin.f32 %v882_v58, 6.0  ;;  %v902_v8 = vmax.f32 %v851_v17, 0.0  ;;  %v1462_v49 = vld [vmem:[%s3264_s5 + $0x420] sm:$0xff] }
 0x1ca   : > { %1614 = vmatpush.msra.mxu3 %v1424_v2  ;;  %v911_v41 = vmax.f32 %v825_v34, 0.0  ;;  %v1252_v38 = vadd.f32 %v961_v5, %v951_v33  ;;  %1678 = vmatpush.msra.mxu2 %v1468_v59  ;;  %v952_v35 = vmin.f32 %v872_v3, 6.0  ;;  %v1410_v5 = vld [vmem:[%s3264_s5 + $0x280] sm:$0xff]  ;;  %v1461_v33 = vld [vmem:[%s3264_s5 + $0x418] sm:$0xff] }
 0x1cb   : > { %v972_v28 = vmin.f32 %v892_v10, 6.0 }
 0x1cc   : > { %1615 = vmatpush.msra.mxu3 %v1423_v14  ;;  %v1253_v61 = vadd.f32 %v1252_v38, %v971_v63  ;;  %v991_v55 = vmin.f32 %v911_v41, 6.0  ;;  %v1414_v14 = vld [vmem:[%s3264_s5 + $0x2a0] sm:$0xff]  ;;  %1679 = vmatpush.msra.mxu2 %v1467_v31  ;;  %v1459_v38 = vld [vmem:[%s3264_s5 + $0x408] sm:$0xff] }
 0x1cd   : > { %v853_v16 = vpop.f32.mrf.mxu2 }
 0x1ce   : > { %1616 = vmatpush.msra.mxu3 %v1422_v4  ;;  %1649 = vmatmul.f32.vlgmr.msra.gmra.mxu0 %v1499_v45  ;;  %v854_v7 = vadd.f32 %v853_v16, %v3062_v23  ;;  %v1254_v16 = vadd.f32 %v1253_v61, %v981_v6  ;;  %v1484_v61 = vld [vmem:[%s3264_s5 + $0x4d0] sm:$0xff] }
 0x1cf   : > { %v826_v18 = vpop.f32.mrf.mxu1  ;;  %1549 = vmatmul.f32.vlgmr.msrb.gmra.mxu3 %v1494_v19  ;;  %1669 = vmatmul.f32.vlgmr.msra.gmra.mxu1 %v1500_v60  ;;  %v1265_v19 = vadd.f32 %v962_v42, %v952_v35  ;;  %v1482_v35 = vld [vmem:[%s3264_s5 + $0x4c0] sm:$0xff] }
 0x1d0   : > { %1617 = vmatpush.msra.mxu3 %v1421_v46  ;;  %v827_v50 = vadd.f32 %v826_v18, %v3044_v15  ;;  %v912_v4 = vmax.f32 %v854_v7, 0.0  ;;  %v1466_v18 = vld [vmem:[%s3264_s5 + $0x440] sm:$0xff]  ;;  %v982_v46 = vmin.f32 %v902_v8, 6.0  ;;  %v1255_v24 = vadd.f32 %v1254_v16, %v991_v55  ;;  %v1485_v8 = vld [vmem:[%s3264_s5 + $0x4d8] sm:$0xff] }
 0x1d1   : > { %1680 = vmatpush.msra.mxu2 %v1466_v18  ;;  %v1266_v12 = vadd.f32 %v1265_v19, %v972_v28  ;;  %v1486_v7 = vld [vmem:[%s3264_s5 + $0x4e0] sm:$0xff]  ;;  %v1479_v19 = vld [vmem:[%s3264_s5 + $0x4a8] sm:$0xff] }
 0x1d2   : > { %1618 = vmatpush.msra.mxu3 %v1420_v26  ;;  %v921_v20 = vmax.f32 %v827_v50, 0.0 }
 0x1d3   : > { %1681 = vmatpush.msra.mxu2 %v1465_v48  ;;  %v1267_v37 = vadd.f32 %v1266_v12, %v982_v46  ;;  %v1477_v48 = vld [vmem:[%s3264_s5 + $0x498] sm:$0xff] }
 0x1d4   : > { %1619 = vmatpush.msra.mxu3 %v1419_v54  ;;  %v1001_v56 = vmin.f32 %v921_v20, 6.0  ;;  %v992_v54 = vmin.f32 %v912_v4, 6.0  ;;  %v1458_v20 = vld [vmem:[%s3264_s5 + $0x400] sm:$0xff]  ;;  %v1480_v4 = vld [vmem:[%s3264_s5 + $0x4b0] sm:$0xff] }
 0x1d5   : > { %v855_v40 = vpop.f32.mrf.mxu2  ;;  %1682 = vmatpush.msra.mxu2 %v1464_v29 }
 0x1d6   : > { %1620 = vmatpush.msra.mxu3 %v1418_v43  ;;  %v856_v13 = vadd.f32 %v855_v40, %v3062_v23  ;;  %v1256_v30 = vadd.f32 %v1255_v24, %v1001_v56  ;;  %v1268_v50 = vadd.f32 %v1267_v37, %v992_v54  ;;  %v1476_v24 = vld [vmem:[%s3264_s5 + $0x490] sm:$0xff] }
 0x1d7   : > { %v829_v51 = vpop.f32.mrf.mxu1  ;;  %1683 = vmatpush.msra.mxu2 %v1463_v52 }
 0x1d8   : > { %v830_v0 = vadd.f32 %v829_v51, %v3044_v15  ;;  %1621 = vmatpush.msra.mxu3 %v1417_v62  ;;  %v922_v26 = vmax.f32 %v856_v13, 0.0  ;;  %v1498_v51 = vperm.slane %v3024_v9, 5  ;;  %v1489_v62 = vld [vmem:[%s3264_s5 + $0x4f8] sm:$0xff]  ;;  %v1460_v9 = vld [vmem:[%s3264_s5 + $0x410] sm:$0xff] }
 0x1d9   : > { %1684 = vmatpush.msra.mxu2 %v1462_v49 }
 0x1da   : > { %v931_v57 = vmax.f32 %v830_v0, 0.0  ;;  %1622 = vmatpush.msra.mxu3 %v1416_v39  ;;  %v1002_v53 = vmin.f32 %v922_v26, 6.0  ;;  %v1487_v39 = vld [vmem:[%s3264_s5 + $0x4e8] sm:$0xff] }
 0x1db   : > { %1685 = vmatpush.msra.mxu2 %v1461_v33  ;;  %v1475_v26 = vld [vmem:[%s3264_s5 + $0x488] sm:$0xff] }
 0x1dc   : > { %1623 = vmatpush.msra.mxu3 %v1415_v22  ;;  %v1011_v27 = vmin.f32 %v931_v57, 6.0  ;;  %v1269_v63 = vadd.f32 %v1268_v50, %v1002_v53  ;;  %v1483_v57 = vld [vmem:[%s3264_s5 + $0x4c8] sm:$0xff] }
 0x1dd   : > { %v858_v2 = vpop.f32.mrf.mxu2  ;;  %1686 = vmatpush.msra.mxu2 %v1460_v9 }
 0x1de   : > { %v859_v45 = vadd.f32 %v858_v2, %v3062_v23  ;;  %1624 = vmatpush.msra.mxu3 %v1414_v14  ;;  %v1257_v40 = vadd.f32 %v1256_v30, %v1011_v27  ;;  %v1481_v14 = vld [vmem:[%s3264_s5 + $0x4b8] sm:$0xff]  ;;  %v1490_v30 = vld [vmem:[%s3265_s6] sm:$0x1] }
 0x1df   : > { %v831_v60 = vpop.f32.mrf.mxu1  ;;  %1687 = vmatpush.msra.mxu2 %v1459_v38 }
 0x1e0   : > { %v832_v25 = vadd.f32 %v831_v60, %v3044_v15  ;;  %v932_v32 = vmax.f32 %v859_v45, 0.0  ;;  %1625 = vmatpush.msra.mxu3 %v1413_v21  ;;  %v1411_v15 = vld [vmem:[%s3264_s5 + $0x288] sm:$0xff]  ;;  %v1478_v21 = vld [vmem:[%s3264_s5 + $0x4a0] sm:$0xff] }
 0x1e1   : > { %1688 = vmatpush.msra.mxu2 %v1458_v20  ;;  %v1147_v45 = vld [vmem:[#allocation2 + $0x8] sm:$0x3] }
 0x1e2   : > { %v941_v34 = vmax.f32 %v832_v25, 0.0  ;;  %1626 = vmatpush.msra.mxu3 %v1412_v44  ;;  %v1012_v11 = vmin.f32 %v932_v32, 6.0 }
 0x1e4   : > { %v1021_v43 = vmin.f32 %v941_v34, 6.0  ;;  %1627 = vmatpush.msra.mxu3 %v1411_v15  ;;  %v1270_v1 = vadd.f32 %v1269_v63, %v1012_v11 }
 0x1e5   : > { %v860_v47 = vpop.f32.mrf.mxu2 }
 0x1e6   : > { %v1258_v58 = vadd.f32 %v1257_v40, %v1021_v43  ;;  %v861_v17 = vadd.f32 %v860_v47, %v3062_v23  ;;  %1628 = vmatpush.msra.mxu3 %v1410_v5  ;;  %v1488_v23 = vld [vmem:[%s3264_s5 + $0x4f0] sm:$0xff] }
 0x1e7   : > { %1629 = vmatmul.f32.vlgmr.msra.gmra.mxu3 %v1498_v51 }
 0x1e8   : > { %v1259_v41 = vrot.slane %v1258_v58, 4  ;;  %v942_v0 = vmax.f32 %v861_v17, 0.0  ;;  %1693 = vmatpush.msrb.mxu3 %v1489_v62 }
 0x1ea   : > { %v1260_v3 = vadd.f32 %v1259_v41, %v1258_v58  ;;  %v1022_v10 = vmin.f32 %v942_v0, 6.0  ;;  %1694 = vmatpush.msrb.mxu3 %v1488_v23 }
 0x1ec   : > { %v1271_v6 = vadd.f32 %v1270_v1, %v1022_v10  ;;  %v1261_v59 = vrot.slane %v1260_v3, 2  ;;  %1695 = vmatpush.msrb.mxu3 %v1487_v39 }
 0x1ee   : > { %v1272_v42 = vrot.slane %v1271_v6, 4  ;;  %1696 = vmatpush.msrb.mxu3 %v1486_v7  ;;  %v1262_v55 = vadd.f32 %v1261_v59, %v1260_v3 }
 0x1f0   : > { %v1273_v22 = vadd.f32 %v1272_v42, %v1271_v6  ;;  %1697 = vmatpush.msrb.mxu3 %v1485_v8  ;;  %v1263_v28 = vrot.slane %v1262_v55, 1 }
 0x1f2   : > { %v1274_v13 = vrot.slane %v1273_v22, 2  ;;  %1698 = vmatpush.msrb.mxu3 %v1484_v61  ;;  %v1264_v56 = vadd.f32 %v1263_v28, %v1262_v55 }
 0x1f4   : > { %v1275_v31 = vadd.f32 %v1274_v13, %v1273_v22  ;;  %1699 = vmatpush.msrb.mxu3 %v1483_v57 }
 0x1f6   : > { %v1276_v2 = vrot.slane %v1275_v31, 1  ;;  %1700 = vmatpush.msrb.mxu3 %v1482_v35 }
 0x1f8   : > { %v1277_v16 = vadd.f32 %v1276_v2, %v1275_v31  ;;  %1701 = vmatpush.msrb.mxu3 %v1481_v14 }
 0x1fa   : > { %v1295_v18 = vrot.slane %v1277_v16, 7  ;;  %1702 = vmatpush.msrb.mxu3 %v1480_v4 }
 0x1fc   : > { %v1310_v46 = vsel %vm1296_vm1, %v1264_v56, %v1295_v18  ;;  %1703 = vmatpush.msrb.mxu3 %v1479_v19 }
 0x1fd   : > { %v1314_v60 = vadd.f32 %v1310_v46, %v1147_v45 }
 0x1fe   : > { %1704 = vmatpush.msrb.mxu3 %v1478_v21 }
 0x1ff   : > { %1320 = vst.msk [vmem:[#allocation2 + $0x8] sm:$0x3] %vm3077_vm8, %v1314_v60 }
 0x200   : > { %1705 = vmatpush.msrb.mxu3 %v1477_v48 }
 0x202   : > { %1706 = vmatpush.msrb.mxu3 %v1476_v24 }
 0x204   : > { %1707 = vmatpush.msrb.mxu3 %v1475_v26 }
 0x206   : > { %v1325_v27 = vld [vmem:[#allocation2 + $0x8] sm:$0x3]  ;;  %1708 = vmatpush.msrb.mxu3 %v1474_v36 }
 0x207   : > { %v1327_v25 = vmul.f32 0.015625, %v1325_v27 }
 0x209   : > { %v1329_v12 = vmax.f32 %v1327_v25, 0.0 }
 0x20b   : > { %v1501_v44 = vperm.slane %v1329_v12, 0  ;;  %v1502_v29 = vperm.slane %v1329_v12, 1 }
 0x20d   : > { %1689 = vmatmul.f32.vlgmr.msra.gmra.mxu2 %v1501_v44  ;;  %1709 = vmatmul.f32.vlgmr.msrb.gmra.mxu3 %v1502_v29 }
 0x243   : > { %v1570_v52 = vpop.f32.mrf.mxu0 }
 0x244   : > { %v1590_v53 = vpop.f32.mrf.mxu1 }
 0x249   : > { %v1530_v54 = vpop.f32.mrf.mxu3 }
 0x24a   : > { %v1531_v34 = vadd.f32 %v1530_v54, %v1490_v30  ;;  %v1610_v43 = vpop.f32.mrf.mxu2 }
 0x24b   : > { %v1650_v50 = vpop.f32.mrf.mxu0 }
 0x24c   : > { %v1670_v58 = vpop.f32.mrf.mxu1 }
 0x252   : > { %v1550_v32 = vpop.f32.mrf.mxu3 }
 0x253   : > { %v1551_v15 = vadd.f32 %v1550_v32, %v1531_v34 }
 0x255   : > { %v1571_v37 = vadd.f32 %v1570_v52, %v1551_v15 }
 0x257   : > { %v1591_v40 = vadd.f32 %v1590_v53, %v1571_v37 }
 0x259   : > { %v1611_v5 = vadd.f32 %v1610_v43, %v1591_v40 }
 0x26a   : > { %v1630_v47 = vpop.f32.mrf.mxu3 }
 0x26b   : > { %v1631_v49 = vadd.f32 %v1630_v47, %v1611_v5 }
 0x26d   : > { %v1651_v11 = vadd.f32 %v1650_v50, %v1631_v49 }
 0x26f   : > { %v1671_v17 = vadd.f32 %v1670_v58, %v1651_v11 }
 0x290   : > { %v1690_v51 = vpop.f32.mrf.mxu2  ;;  %v1710_v33 = vpop.f32.mrf.mxu3 }
 0x291   : > { %v1691_v62 = vadd.f32 %v1690_v51, %v1671_v17 }
 0x293   : > { %v1711_v63 = vadd.f32 %v1710_v33, %v1691_v62 }
 0x295   : > { %v1714_v41 = vsel %vm1713_vm9, %v1711_v63, -inf }
 0x296   : > { %1715 = vmax.xlane.f32.xlu0 %v1714_v41 }
 0x309   : > { %v1716_v0 = vpop.xlane.xlu0 %1715 }
 0x30a   : > { %v1717_v23 = vsub.f32 %v1711_v63, %v1716_v0 }
 0x30c   : > { %v1718_v9 = vmul.f32 1.442695, %v1717_v23 }
 0x30e   : > { %2036 = vpow2.f32 %v1718_v9 }
 0x314   : > { %v2037_v1 = vpop.eup %2036 }
 0x315   : > { %v1720_v3 = vsel %vm1713_vm9, %v2037_v1, 0.0 }
 0x316   : > { %1721 = vadd.xlane.f32.xlu0 %v1720_v3 }
 0x389   : > { %v1722_v10 = vpop.xlane.xlu0 %1721 }
 0x38a   : > { %2038 = vrcp.f32 %v1722_v10  ;;  %v1734_v7 = vand.u32 2147483648, %v1722_v10  ;;  %v1732_v59 = vand.u32 2147483647, %v1722_v10  ;;  %vm1728_vm11 = vweird.f32 %v1722_v10 }
 0x38c   : > { %v1735_v8 = vor.u32 1.1754944e-38, %v1734_v7  ;;  %vm1733_vm13 = vcmp.eq.f32.partialorder %v1732_v59, 8.507059e+37 }
 0x390   : > { %v2039_v39 = vpop.eup %2038 }
 0x391   : > { %v1724_v38 = vmul.f32 %v2039_v39, %v1722_v10  ;;  %vm1729_vm10 = vweird.f32 %v2039_v39 }
 0x392   : > { %vm1730_vm12 = vmor %vm1728_vm11, %vm1729_vm10 }
 0x393   : > { %v1725_v6 = vsub.f32 1.0, %v1724_v38 }
 0x395   : > { %v1726_v20 = vmul.f32 %v2039_v39, %v1725_v6 }
 0x397   : > { %v1727_v42 = vadd.f32 %v2039_v39, %v1726_v20 }
 0x399   : > { %v1731_v22 = vsel %vm1730_vm12, %v2039_v39, %v1727_v42 }
 0x39a   : > { %v1736_v61 = vsel %vm1733_vm13, %v1735_v8, %v1731_v22 }
 0x39b   : > { %v1737_v55 = vmul.f32 %v2037_v1, %v1736_v61 }
 0x39d   : > { %1738 = vst.msk [vmem:[%s293_s30] sm:$0x1] %vm1713_vm9, %v1737_v55 }
 0x39e   : > { %2067 = shalt.err (!%p2064_p5)
}
 0x39f   : > { %1979 = dma.vmem_to_hbm [thread:$0]  (%p2201_p4), %s1751_s8, 16, %s1753_s10, %s1740_s12  }
 0x3a0 PF: > { %p1985_p6 = scmp.ge.s32.totalorder %s2118_s29, 2  ;;  %s1764_s20 = sand.u32 1, %s2098_s24  }
 0x3a1   : > { %s1765_s22 = scalar_lea.sflag [#allocation4], %s1764_s20 }
 0x3a2   : > { %p1982_p7 = pnand %p1985_p6, %p2208_p8 }
 0x3a4   : > { %p1983_p9 = pneg %p1982_p7 }
 0x3a6   : > { %2093 = dma.done.wait (%p1983_p9), %s1765_s22, 16  }
 0x3a7   : > { %2095 = vsyncadd (%p1983_p9), %s1765_s22, 4294967280  ;;  %s20_s29 = sadd.s32 1, %s2118_s29   ;;  %s3271_s24 = smov %s2102_s25 }
 0x3a8   : > { %p17_p10 = scmp.ge.s32.totalorder %s20_s29, 4   ;;  %s3272_s25 = smov %s2106_s26 }
 0x3a9   : > { %s3273_s26 = smov %s2214_s14  ;;  %s3274_s27 = smov %s2114_s28 }
 0x3aa   : > { %s3275_s28 = smov %s3277_s9  ;;  %19 = sbr.rel (!%p17_p10) target bundleno = 4 (0x4), region = 91 }
 0x3af   :  { %1770 = vsyncpa [#allocation4], 1 }
 0x3b0   :  { %1772 = vsyncpa [#allocation4 + $0x1], 1 }

</bundles_post_ra>
